<compile_context>
chip_gen: v6e
topology: v6e:2x2x1
jax: 0.10.0
libtpu: 0.0.40
codegen_flags: <defaults>
</compile_context>

<pallas_src>
import functools

import jax
import jax.numpy as jnp
from jax import lax
from jax.experimental import pallas as pl
from jax.experimental.pallas import tpu as pltpu


def _round_up(x, m):
    return ((x + m - 1) // m) * m


# --------------------------- fused forward kernel ----------------------------

def _make_fused_kernel(num_layers, T, BB, H, PG):
    """Fused kernel for fixed (num_layers, T, block_batch BB, H, gate pad PG)."""

    unroll = True if T <= 16 else 8        # partial unroll for long sequences

    def kernel(*args):
        # args layout:
        #   x_ref                      (T*BB, D)    bf16, time-major block
        #   [w_ih, w_hh, b] * L        (Din,4PG) bf16, (H,4PG) bf16, (1,4PG) f32
        #   w_fc, b_fc                 (H, Opad) bf16, (1, Opad) f32
        #   out_ref                    (BB, Opad)   f32, lane-dense
        #   gx_sc                      (T*BB, 4PG)  f32 scratch (hoisted x@W_ih+b)
        #   seq_a, seq_b               (T*BB, H)    bf16 ping-pong scratch
        x_ref = args[0]
        layer_refs = args[1:1 + 3 * num_layers]
        wfc_ref = args[1 + 3 * num_layers]
        bfc_ref = args[2 + 3 * num_layers]
        out_ref = args[3 + 3 * num_layers]
        gx_sc = args[4 + 3 * num_layers]
        seq_sc = (args[5 + 3 * num_layers], args[6 + 3 * num_layers])

        def run_layer(in_ref, out_seq_ref, wih_ref, whh_ref, b_ref):
            # Hoisted input projection for every timestep at once (bf16 MXU
            # operands, f32 accumulation); reads directly from the input ref so
            # the value's live range is just this dot.
            gx_sc[...] = (
                jnp.dot(in_ref[...], wih_ref[...],
                        preferred_element_type=jnp.float32)
                + b_ref[...]
            )
            whh = whh_ref[...]                        # (H, 4PG) bf16, loop-invariant

            def step(t, carry):
                h, c = carry                          # f32 (BB, H)
                row = pl.multiple_of(t * BB, 8)       # BB % 8 == 0 by construction
                rec = jnp.dot(h.astype(jnp.bfloat16), whh,
                              preferred_element_type=jnp.float32)
                pre = gx_sc[pl.ds(row, BB), :] + rec  # f32 (BB, 4PG)
                # torch gate order [i, f, g, o]; each gate block starts on a
                # 128-lane boundary -> no XLU lane shifts on the serial chain.
                i_g = jax.nn.sigmoid(pre[:, 0 * PG:0 * PG + H])
                f_g = jax.nn.sigmoid(pre[:, 1 * PG:1 * PG + H])
                g_g = jnp.tanh(pre[:, 2 * PG:2 * PG + H])
                o_g = jax.nn.sigmoid(pre[:, 3 * PG:3 * PG + H])
                c_new = f_g * c + i_g * g_g
                h_new = o_g * jnp.tanh(c_new)
                if out_seq_ref is not None:           # static trace-time bool
                    out_seq_ref[pl.ds(row, BB), :] = h_new.astype(jnp.bfloat16)
                return h_new, c_new

            zero = jnp.zeros((BB, H), jnp.float32)
            h_last, _ = lax.fori_loop(0, T, step, (zero, zero), unroll=unroll)
            return h_last

        in_ref = x_ref
        h_last = None
        for layer in range(num_layers):
            wih_ref, whh_ref, b_ref = layer_refs[3 * layer:3 * layer + 3]
            last = layer == num_layers - 1
            out_seq = None if last else seq_sc[layer % 2]
            h_last = run_layer(in_ref, out_seq, wih_ref, whh_ref, b_ref)
            in_ref = out_seq
            # inter-layer dropout: identity in eval mode

        # out[:, -1, :] -> Dropout(eval: identity) -> Linear -> ReLU, fused.
        y = (jnp.dot(h_last.astype(jnp.bfloat16), wfc_ref[...],
                     preferred_element_type=jnp.float32) + bfc_ref[...])
        out_ref[...] = jnp.maximum(y, 0.0).astype(out_ref.dtype)

    return kernel


@functools.partial(jax.jit, static_argnames=("output_size",))
def vanilla_lstm_forward(params, x_btd, *, output_size):
    """x_btd: (B, T, D) batch-first like the PyTorch module. Returns (B, output_size)."""
    B, T, D = x_btd.shape
    lstm_params = params["lstm"]
    num_layers = len(lstm_params)
    H = lstm_params[0][1].shape[0]                 # w_hh is (H, 4*PG)
    PG = lstm_params[0][1].shape[1] // 4
    w_fc, b_fc = params["fc"]
    Opad = w_fc.shape[1]

    # Batch padding / blocking: blocks of <= 128 rows, multiple of 8 sublanes.
    Bpad = _round_up(B, 8)
    if Bpad > 128:
        BB = 128
        Bpad = _round_up(B, 128)
    else:
        BB = Bpad
    nblk = Bpad // BB

    # batch-first -> time-major, pad batch, group per grid block, cast to bf16.
    # TODO(synk): at large T*B*D accept time-major input from the caller to
    #             avoid this wrapper-side HBM round-trip.
    x_tm = jnp.transpose(x_btd, (1, 0, 2))                         # (T, B, D)
    x_tm = jnp.pad(x_tm, ((0, 0), (0, Bpad - B), (0, 0)))
    x_blk = (x_tm.reshape(T, nblk, BB, D)
                 .transpose(1, 0, 2, 3)
                 .reshape(nblk, T * BB, D)
                 .astype(jnp.bfloat16))

    flat_w = []
    for (w_ih, w_hh, b) in lstm_params:
        flat_w += [w_ih, w_hh, b]

    # --------------------------- VMEM budget ---------------------------------
    def _nbytes(a):
        return a.size * a.dtype.itemsize

    blk_in = T * BB * D * 2                                        # bf16 x block
    blk_out = BB * Opad * 4
    w_bytes = sum(_nbytes(w) for w in flat_w) + _nbytes(w_fc) + _nbytes(b_fc)
    scratch_bytes = T * BB * 4 * PG * 4 + 2 * T * BB * H * 2
    resident = 2 * (blk_in + blk_out) + 2 * w_bytes + scratch_bytes
    if resident > 48 * (1 << 20):
        # TODO(synk): streaming fallback — keep layer weights in HBM
        #             (memory_space=pl.ANY) and double-buffer prefetch layer l+1
        #             with pltpu.make_async_copy while layer l's recurrence runs.
        raise NotImplementedError(
            f"fused VMEM-resident path needs ~{resident >> 20} MiB > 48 MiB budget")
    vmem_limit = min(max(32 << 20, int(resident * 1.5) + (2 << 20)), 64 << 20)

    # ------------------------------ specs -------------------------------------
    x_spec = pl.BlockSpec((None, T * BB, D), lambda b: (b, 0, 0))

    def _full_spec(arr):
        nd = arr.ndim
        return pl.BlockSpec(arr.shape, lambda b, _nd=nd: (0,) * _nd)

    in_specs = ([x_spec] + [_full_spec(w) for w in flat_w]
                + [_full_spec(w_fc), _full_spec(b_fc)])
    out_spec = pl.BlockSpec((BB, Opad), lambda b: (b, 0))

    out_pad = pl.pallas_call(
        _make_fused_kernel(num_layers, T, BB, H, PG),
        out_shape=jax.ShapeDtypeStruct((Bpad, Opad), jnp.float32),
        grid=(nblk,),
        in_specs=in_specs,
        out_specs=out_spec,
        scratch_shapes=[
            pltpu.VMEM((T * BB, 4 * PG), jnp.float32),   # hoisted x @ W_ih + b
            pltpu.VMEM((T * BB, H), jnp.bfloat16),       # ping-pong h sequence A
            pltpu.VMEM((T * BB, H), jnp.bfloat16),       # ping-pong h sequence B
        ],
        compiler_params=pltpu.CompilerParams(
            dimension_semantics=("parallel",),
            vmem_limit_bytes=vmem_limit),
    )(x_blk, *flat_w, w_fc, b_fc)

    return out_pad[:B, :output_size]


# ----------------------------- parameter helpers -----------------------------

def init_torch_params(key, input_size, hidden_size, output_size, num_layers):
    """PyTorch-layout params, U(-1/sqrt(H), 1/sqrt(H)) init (torch shapes)."""
    k = hidden_size ** -0.5
    keys = jax.random.split(key, num_layers * 4 + 2)
    ki = 0
    lstm = []
    for layer in range(num_layers):
        in_dim = input_size if layer == 0 else hidden_size
        w_ih = jax.random.uniform(keys[ki], (4 * hidden_size, in_dim),
                                  minval=-k, maxval=k, dtype=jnp.float32); ki += 1
        w_hh = jax.random.uniform(keys[ki], (4 * hidden_size, hidden_size),
                                  minval=-k, maxval=k, dtype=jnp.float32); ki += 1
        b_ih = jax.random.uniform(keys[ki], (4 * hidden_size,),
                                  minval=-k, maxval=k, dtype=jnp.float32); ki += 1
        b_hh = jax.random.uniform(keys[ki], (4 * hidden_size,),
                                  minval=-k, maxval=k, dtype=jnp.float32); ki += 1
        lstm.append((w_ih, w_hh, b_ih, b_hh))
    w_fc = jax.random.uniform(keys[ki], (output_size, hidden_size),
                              minval=-k, maxval=k, dtype=jnp.float32); ki += 1
    b_fc = jax.random.uniform(keys[ki], (output_size,),
                              minval=-k, maxval=k, dtype=jnp.float32)
    return {"lstm": lstm, "fc": (w_fc, b_fc)}


def _pad_gate_blocks(w_t, H, PG):
    """(rows, 4H) torch-order gate columns -> (rows, 4*PG), each gate starting on
    a 128-lane-aligned column offset k*PG (padding columns are zero)."""
    rows = w_t.shape[0]
    out = jnp.zeros((rows, 4 * PG), w_t.dtype)
    for k in range(4):
        out = out.at[:, k * PG:k * PG + H].set(w_t[:, k * H:(k + 1) * H])
    return out


def prepare_params(torch_params):
    """Torch layout -> kernel layout: transpose, fold bias, lane-align gate
    blocks, bf16 matmul operands (biases stay f32)."""
    lstm = []
    for (w_ih, w_hh, b_ih, b_hh) in torch_params["lstm"]:
        H = w_hh.shape[1]
        PG = H if H % 128 == 0 else _round_up(H, 128)
        lstm.append((
            _pad_gate_blocks(w_ih.T, H, PG).astype(jnp.bfloat16),    # (Din, 4PG)
            _pad_gate_blocks(w_hh.T, H, PG).astype(jnp.bfloat16),    # (H,   4PG)
            _pad_gate_blocks((b_ih + b_hh)[None, :], H, PG),         # (1,   4PG) f32
        ))
    w_fc, b_fc = torch_params["fc"]
    O, H = w_fc.shape
    Opad = O if O % 128 == 0 else _round_up(O, 128)
    w_fc_p = (jnp.zeros((H, Opad), jnp.float32).at[:, :O].set(w_fc.T)
              .astype(jnp.bfloat16))
    b_fc_p = jnp.zeros((1, Opad), jnp.float32).at[:, :O].set(b_fc)
    return {"lstm": lstm, "fc": (w_fc_p, b_fc_p)}


# ------------------------- pure-JAX references (checks) -----------------------

def reference_forward(torch_params, x_btd, *, bf16_matmul=False):
    """Pure-JAX re-implementation of VanillaLSTM.forward (eval mode).
    bf16_matmul=True mirrors the kernel's bf16-operand / f32-accumulate matmuls."""
    B, T, _ = x_btd.shape
    hp = lax.Precision.HIGHEST

    def mm(a, b):
        if bf16_matmul:
            return jnp.dot(a.astype(jnp.bfloat16), b.astype(jnp.bfloat16),
                           preferred_element_type=jnp.float32)
        return jnp.dot(a, b, precision=hp)

    seq = x_btd
    for (w_ih, w_hh, b_ih, b_hh) in torch_params["lstm"]:
        H = w_hh.shape[1]
        h = jnp.zeros((B, H), jnp.float32)
        c = jnp.zeros((B, H), jnp.float32)
        outs = []
        for t in range(T):
            g = mm(seq[:, t, :], w_ih.T) + (b_ih + b_hh) + mm(h, w_hh.T)
            i_g = jax.nn.sigmoid(g[:, 0 * H:1 * H])
            f_g = jax.nn.sigmoid(g[:, 1 * H:2 * H])
            g_g = jnp.tanh(g[:, 2 * H:3 * H])
            o_g = jax.nn.sigmoid(g[:, 3 * H:4 * H])
            c = f_g * c + i_g * g_g
            h = o_g * jnp.tanh(c)
            outs.append(h)
        seq = jnp.stack(outs, axis=1)                  # (B, T, H)
    w_fc, b_fc = torch_params["fc"]
    y = mm(seq[:, -1, :], w_fc.T) + b_fc
    return jnp.maximum(y, 0.0)


# ----------------------------------- main -------------------------------------

if __name__ == "__main__":
    batch, seq_len = 8, 8
    input_size_dyn, hidden_size, output_size, num_layers = 16, 32, 8, 2

    key = jax.random.PRNGKey(0)
    k_params, k_x = jax.random.split(key)
    torch_params = init_torch_params(k_params, input_size_dyn, hidden_size,
                                     output_size, num_layers)
    params = prepare_params(torch_params)
    x = jax.random.normal(k_x, (batch, seq_len, input_size_dyn), dtype=jnp.float32)

    out = vanilla_lstm_forward(params, x, output_size=output_size)
    jax.block_until_ready(out)
    assert out.shape == (batch, output_size)

    # Tight check vs a bf16-operand / f32-accumulate mirror of the kernel math.
    ref_bf16 = reference_forward(torch_params, x, bf16_matmul=True)
    err_bf16 = jnp.max(jnp.abs(out - ref_bf16))
    assert jnp.allclose(out, ref_bf16, rtol=2e-3, atol=2e-3), f"bf16-mirror err {err_bf16}"

    # Loose check vs the full-f32 torch-semantics reference.
    ref_f32 = reference_forward(torch_params, x, bf16_matmul=False)
    err_f32 = jnp.max(jnp.abs(out - ref_f32))
    assert jnp.allclose(out, ref_f32, rtol=5e-2, atol=5e-2), f"f32-ref err {err_f32}"

    print("KERNEL_OK")
</pallas_src>

<mosaic_0001>
module attributes {stable_mosaic.version = 11 : i64} {
  func.func @kernel(%arg0: i32, %arg1: memref<1x64x16xbf16, #tpu.memory_space<vmem>>, %arg2: memref<16x512xbf16, #tpu.memory_space<vmem>>, %arg3: memref<32x512xbf16, #tpu.memory_space<vmem>>, %arg4: memref<1x512xf32, #tpu.memory_space<vmem>>, %arg5: memref<32x512xbf16, #tpu.memory_space<vmem>>, %arg6: memref<32x512xbf16, #tpu.memory_space<vmem>>, %arg7: memref<1x512xf32, #tpu.memory_space<vmem>>, %arg8: memref<32x128xbf16, #tpu.memory_space<vmem>>, %arg9: memref<1x128xf32, #tpu.memory_space<vmem>>, %arg10: memref<8x128xf32, #tpu.memory_space<vmem>>, %arg11: memref<64x512xf32, #tpu.memory_space<vmem>>, %arg12: memref<64x32xbf16, #tpu.memory_space<vmem>>, %arg13: memref<64x32xbf16, #tpu.memory_space<vmem>>) attributes {dimension_semantics = [#tpu.dimension_semantics<parallel>], iteration_bounds = array<i64: 1>, scalar_prefetch = 0 : i64, scratch_operands = 3 : i64, tpu.core_type = #tpu.core_type<tc>, window_params = [{transform_indices = @transform_0, window_bounds = array<i64: 1, 64, 16>}, {pipeline_mode = #tpu.pipeline_mode<synchronous>, transform_indices = @transform_1, window_bounds = array<i64: 16, 512>}, {pipeline_mode = #tpu.pipeline_mode<synchronous>, transform_indices = @transform_2, window_bounds = array<i64: 32, 512>}, {pipeline_mode = #tpu.pipeline_mode<synchronous>, transform_indices = @transform_3, window_bounds = array<i64: 1, 512>}, {pipeline_mode = #tpu.pipeline_mode<synchronous>, transform_indices = @transform_4, window_bounds = array<i64: 32, 512>}, {pipeline_mode = #tpu.pipeline_mode<synchronous>, transform_indices = @transform_5, window_bounds = array<i64: 32, 512>}, {pipeline_mode = #tpu.pipeline_mode<synchronous>, transform_indices = @transform_6, window_bounds = array<i64: 1, 512>}, {pipeline_mode = #tpu.pipeline_mode<synchronous>, transform_indices = @transform_7, window_bounds = array<i64: 32, 128>}, {pipeline_mode = #tpu.pipeline_mode<synchronous>, transform_indices = @transform_8, window_bounds = array<i64: 1, 128>}, {transform_indices = @transform_9, window_bounds = array<i64: 8, 128>}]} {
    %c0 = arith.constant 0 : index
    %c0_0 = arith.constant 0 : index
    %c0_1 = arith.constant 0 : index
    %0 = vector.load %arg1[%c0, %c0_0, %c0_1] : memref<1x64x16xbf16, #tpu.memory_space<vmem>>, vector<1x64x16xbf16>
    %1 = vector.shape_cast %0 : vector<1x64x16xbf16> to vector<64x16xbf16>
    %c0_2 = arith.constant 0 : index
    %c0_3 = arith.constant 0 : index
    %2 = vector.load %arg2[%c0_2, %c0_3] : memref<16x512xbf16, #tpu.memory_space<vmem>>, vector<16x512xbf16>
    %cst = arith.constant dense<0.000000e+00> : vector<64x512xf32>
    %3 = tpu.matmul %1, %2, %cst {dimension_numbers = #tpu.dot_dimension_numbers<[1], [0], [0], [1], [0, 0, 1, 1], [], []>} : vector<64x16xbf16>, vector<16x512xbf16>, vector<64x512xf32> -> vector<64x512xf32>
    %c0_4 = arith.constant 0 : index
    %c0_5 = arith.constant 0 : index
    %4 = vector.load %arg4[%c0_4, %c0_5] : memref<1x512xf32, #tpu.memory_space<vmem>>, vector<1x512xf32>
    %5 = vector.broadcast %4 : vector<1x512xf32> to vector<64x512xf32>
    %6 = arith.addf %3, %5 : vector<64x512xf32>
    %c0_6 = arith.constant 0 : index
    %c0_7 = arith.constant 0 : index
    %7 = vector.load %arg11[%c0_6, %c0_7] : memref<64x512xf32, #tpu.memory_space<vmem>>, vector<64x512xf32>
    tpu.vector_store %arg11[%c0_6, %c0_7], %6 {strides = array<i32>} : memref<64x512xf32, #tpu.memory_space<vmem>>, vector<64x512xf32>,
    %c0_8 = arith.constant 0 : index
    %c0_9 = arith.constant 0 : index
    %8 = vector.load %arg3[%c0_8, %c0_9] : memref<32x512xbf16, #tpu.memory_space<vmem>>, vector<32x512xbf16>
    %cst_10 = arith.constant 0.000000e+00 : f32
    %9 = vector.broadcast %cst_10 : f32 to vector<8x32xf32>
    %c0_i32 = arith.constant 0 : i32
    %c8_i32 = arith.constant 8 : i32
    %10 = arith.muli %c0_i32, %c8_i32 : i32
    %11 = tpu.assume_multiple %10, 8 : i32
    %12 = arith.truncf %9 : vector<8x32xf32> to vector<8x32xbf16>
    %cst_11 = arith.constant dense<0.000000e+00> : vector<8x512xf32>
    %13 = tpu.matmul %12, %8, %cst_11 {dimension_numbers = #tpu.dot_dimension_numbers<[1], [0], [0], [1], [0, 0, 1, 1], [], []>} : vector<8x32xbf16>, vector<32x512xbf16>, vector<8x512xf32> -> vector<8x512xf32>
    %14 = arith.index_cast %11 : i32 to index
    %c0_12 = arith.constant 0 : index
    %15 = vector.load %arg11[%14, %c0_12] : memref<64x512xf32, #tpu.memory_space<vmem>>, vector<8x512xf32>
    %16 = arith.addf %15, %13 : vector<8x512xf32>
    %17 = vector.extract_strided_slice %16 {offsets = [0, 0], sizes = [8, 32], strides = [1, 1]} : vector<8x512xf32> to vector<8x32xf32>
    %18 = arith.negf %17 : vector<8x32xf32>
    %19 = math.exp %18 : vector<8x32xf32>
    %cst_13 = arith.constant 1.000000e+00 : f32
    %20 = vector.broadcast %cst_13 : f32 to vector<8x32xf32>
    %21 = arith.addf %20, %19 : vector<8x32xf32>
    %22 = arith.divf %20, %21 : vector<8x32xf32>
    %23 = vector.extract_strided_slice %16 {offsets = [0, 128], sizes = [8, 32], strides = [1, 1]} : vector<8x512xf32> to vector<8x32xf32>
    %24 = arith.negf %23 : vector<8x32xf32>
    %25 = math.exp %24 : vector<8x32xf32>
    %cst_14 = arith.constant 1.000000e+00 : f32
    %26 = vector.broadcast %cst_14 : f32 to vector<8x32xf32>
    %27 = arith.addf %26, %25 : vector<8x32xf32>
    %28 = arith.divf %26, %27 : vector<8x32xf32>
    %29 = vector.extract_strided_slice %16 {offsets = [0, 256], sizes = [8, 32], strides = [1, 1]} : vector<8x512xf32> to vector<8x32xf32>
    %30 = math.tanh %29 : vector<8x32xf32>
    %31 = vector.extract_strided_slice %16 {offsets = [0, 384], sizes = [8, 32], strides = [1, 1]} : vector<8x512xf32> to vector<8x32xf32>
    %32 = arith.negf %31 : vector<8x32xf32>
    %33 = math.exp %32 : vector<8x32xf32>
    %cst_15 = arith.constant 1.000000e+00 : f32
    %34 = vector.broadcast %cst_15 : f32 to vector<8x32xf32>
    %35 = arith.addf %34, %33 : vector<8x32xf32>
    %36 = arith.divf %34, %35 : vector<8x32xf32>
    %37 = arith.mulf %28, %9 : vector<8x32xf32>
    %38 = arith.mulf %22, %30 : vector<8x32xf32>
    %39 = arith.addf %37, %38 : vector<8x32xf32>
    %40 = math.tanh %39 : vector<8x32xf32>
    %41 = arith.mulf %36, %40 : vector<8x32xf32>
    %42 = arith.truncf %41 : vector<8x32xf32> to vector<8x32xbf16>
    %43 = arith.index_cast %11 : i32 to index
    %c0_16 = arith.constant 0 : index
    %44 = vector.load %arg12[%43, %c0_16] : memref<64x32xbf16, #tpu.memory_space<vmem>>, vector<8x32xbf16>
    tpu.vector_store %arg12[%43, %c0_16], %42 {strides = array<i32>} : memref<64x32xbf16, #tpu.memory_space<vmem>>, vector<8x32xbf16>,
    %c1_i32 = arith.constant 1 : i32
    %c8_i32_17 = arith.constant 8 : i32
    %45 = arith.muli %c1_i32, %c8_i32_17 : i32
    %46 = tpu.assume_multiple %45, 8 : i32
    %47 = arith.truncf %41 : vector<8x32xf32> to vector<8x32xbf16>
    %cst_18 = arith.constant dense<0.000000e+00> : vector<8x512xf32>
    %48 = tpu.matmul %47, %8, %cst_18 {dimension_numbers = #tpu.dot_dimension_numbers<[1], [0], [0], [1], [0, 0, 1, 1], [], []>} : vector<8x32xbf16>, vector<32x512xbf16>, vector<8x512xf32> -> vector<8x512xf32>
    %49 = arith.index_cast %46 : i32 to index
    %c0_19 = arith.constant 0 : index
    %50 = vector.load %arg11[%49, %c0_19] : memref<64x512xf32, #tpu.memory_space<vmem>>, vector<8x512xf32>
    %51 = arith.addf %50, %48 : vector<8x512xf32>
    %52 = vector.extract_strided_slice %51 {offsets = [0, 0], sizes = [8, 32], strides = [1, 1]} : vector<8x512xf32> to vector<8x32xf32>
    %53 = arith.negf %52 : vector<8x32xf32>
    %54 = math.exp %53 : vector<8x32xf32>
    %cst_20 = arith.constant 1.000000e+00 : f32
    %55 = vector.broadcast %cst_20 : f32 to vector<8x32xf32>
    %56 = arith.addf %55, %54 : vector<8x32xf32>
    %57 = arith.divf %55, %56 : vector<8x32xf32>
    %58 = vector.extract_strided_slice %51 {offsets = [0, 128], sizes = [8, 32], strides = [1, 1]} : vector<8x512xf32> to vector<8x32xf32>
    %59 = arith.negf %58 : vector<8x32xf32>
    %60 = math.exp %59 : vector<8x32xf32>
    %cst_21 = arith.constant 1.000000e+00 : f32
    %61 = vector.broadcast %cst_21 : f32 to vector<8x32xf32>
    %62 = arith.addf %61, %60 : vector<8x32xf32>
    %63 = arith.divf %61, %62 : vector<8x32xf32>
    %64 = vector.extract_strided_slice %51 {offsets = [0, 256], sizes = [8, 32], strides = [1, 1]} : vector<8x512xf32> to vector<8x32xf32>
    %65 = math.tanh %64 : vector<8x32xf32>
    %66 = vector.extract_strided_slice %51 {offsets = [0, 384], sizes = [8, 32], strides = [1, 1]} : vector<8x512xf32> to vector<8x32xf32>
    %67 = arith.negf %66 : vector<8x32xf32>
    %68 = math.exp %67 : vector<8x32xf32>
    %cst_22 = arith.constant 1.000000e+00 : f32
    %69 = vector.broadcast %cst_22 : f32 to vector<8x32xf32>
    %70 = arith.addf %69, %68 : vector<8x32xf32>
    %71 = arith.divf %69, %70 : vector<8x32xf32>
    %72 = arith.mulf %63, %39 : vector<8x32xf32>
    %73 = arith.mulf %57, %65 : vector<8x32xf32>
    %74 = arith.addf %72, %73 : vector<8x32xf32>
    %75 = math.tanh %74 : vector<8x32xf32>
    %76 = arith.mulf %71, %75 : vector<8x32xf32>
    %77 = arith.truncf %76 : vector<8x32xf32> to vector<8x32xbf16>
    %78 = arith.index_cast %46 : i32 to index
    %c0_23 = arith.constant 0 : index
    %79 = vector.load %arg12[%78, %c0_23] : memref<64x32xbf16, #tpu.memory_space<vmem>>, vector<8x32xbf16>
    tpu.vector_store %arg12[%78, %c0_23], %77 {strides = array<i32>} : memref<64x32xbf16, #tpu.memory_space<vmem>>, vector<8x32xbf16>,
    %c2_i32 = arith.constant 2 : i32
    %c8_i32_24 = arith.constant 8 : i32
    %80 = arith.muli %c2_i32, %c8_i32_24 : i32
    %81 = tpu.assume_multiple %80, 8 : i32
    %82 = arith.truncf %76 : vector<8x32xf32> to vector<8x32xbf16>
    %cst_25 = arith.constant dense<0.000000e+00> : vector<8x512xf32>
    %83 = tpu.matmul %82, %8, %cst_25 {dimension_numbers = #tpu.dot_dimension_numbers<[1], [0], [0], [1], [0, 0, 1, 1], [], []>} : vector<8x32xbf16>, vector<32x512xbf16>, vector<8x512xf32> -> vector<8x512xf32>
    %84 = arith.index_cast %81 : i32 to index
    %c0_26 = arith.constant 0 : index
    %85 = vector.load %arg11[%84, %c0_26] : memref<64x512xf32, #tpu.memory_space<vmem>>, vector<8x512xf32>
    %86 = arith.addf %85, %83 : vector<8x512xf32>
    %87 = vector.extract_strided_slice %86 {offsets = [0, 0], sizes = [8, 32], strides = [1, 1]} : vector<8x512xf32> to vector<8x32xf32>
    %88 = arith.negf %87 : vector<8x32xf32>
    %89 = math.exp %88 : vector<8x32xf32>
    %cst_27 = arith.constant 1.000000e+00 : f32
    %90 = vector.broadcast %cst_27 : f32 to vector<8x32xf32>
    %91 = arith.addf %90, %89 : vector<8x32xf32>
    %92 = arith.divf %90, %91 : vector<8x32xf32>
    %93 = vector.extract_strided_slice %86 {offsets = [0, 128], sizes = [8, 32], strides = [1, 1]} : vector<8x512xf32> to vector<8x32xf32>
    %94 = arith.negf %93 : vector<8x32xf32>
    %95 = math.exp %94 : vector<8x32xf32>
    %cst_28 = arith.constant 1.000000e+00 : f32
    %96 = vector.broadcast %cst_28 : f32 to vector<8x32xf32>
    %97 = arith.addf %96, %95 : vector<8x32xf32>
    %98 = arith.divf %96, %97 : vector<8x32xf32>
    %99 = vector.extract_strided_slice %86 {offsets = [0, 256], sizes = [8, 32], strides = [1, 1]} : vector<8x512xf32> to vector<8x32xf32>
    %100 = math.tanh %99 : vector<8x32xf32>
    %101 = vector.extract_strided_slice %86 {offsets = [0, 384], sizes = [8, 32], strides = [1, 1]} : vector<8x512xf32> to vector<8x32xf32>
    %102 = arith.negf %101 : vector<8x32xf32>
    %103 = math.exp %102 : vector<8x32xf32>
    %cst_29 = arith.constant 1.000000e+00 : f32
    %104 = vector.broadcast %cst_29 : f32 to vector<8x32xf32>
    %105 = arith.addf %104, %103 : vector<8x32xf32>
    %106 = arith.divf %104, %105 : vector<8x32xf32>
    %107 = arith.mulf %98, %74 : vector<8x32xf32>
    %108 = arith.mulf %92, %100 : vector<8x32xf32>
    %109 = arith.addf %107, %108 : vector<8x32xf32>
    %110 = math.tanh %109 : vector<8x32xf32>
    %111 = arith.mulf %106, %110 : vector<8x32xf32>
    %112 = arith.truncf %111 : vector<8x32xf32> to vector<8x32xbf16>
    %113 = arith.index_cast %81 : i32 to index
    %c0_30 = arith.constant 0 : index
    %114 = vector.load %arg12[%113, %c0_30] : memref<64x32xbf16, #tpu.memory_space<vmem>>, vector<8x32xbf16>
    tpu.vector_store %arg12[%113, %c0_30], %112 {strides = array<i32>} : memref<64x32xbf16, #tpu.memory_space<vmem>>, vector<8x32xbf16>,
    %c3_i32 = arith.constant 3 : i32
    %c8_i32_31 = arith.constant 8 : i32
    %115 = arith.muli %c3_i32, %c8_i32_31 : i32
    %116 = tpu.assume_multiple %115, 8 : i32
    %117 = arith.truncf %111 : vector<8x32xf32> to vector<8x32xbf16>
    %cst_32 = arith.constant dense<0.000000e+00> : vector<8x512xf32>
    %118 = tpu.matmul %117, %8, %cst_32 {dimension_numbers = #tpu.dot_dimension_numbers<[1], [0], [0], [1], [0, 0, 1, 1], [], []>} : vector<8x32xbf16>, vector<32x512xbf16>, vector<8x512xf32> -> vector<8x512xf32>
    %119 = arith.index_cast %116 : i32 to index
    %c0_33 = arith.constant 0 : index
    %120 = vector.load %arg11[%119, %c0_33] : memref<64x512xf32, #tpu.memory_space<vmem>>, vector<8x512xf32>
    %121 = arith.addf %120, %118 : vector<8x512xf32>
    %122 = vector.extract_strided_slice %121 {offsets = [0, 0], sizes = [8, 32], strides = [1, 1]} : vector<8x512xf32> to vector<8x32xf32>
    %123 = arith.negf %122 : vector<8x32xf32>
    %124 = math.exp %123 : vector<8x32xf32>
    %cst_34 = arith.constant 1.000000e+00 : f32
    %125 = vector.broadcast %cst_34 : f32 to vector<8x32xf32>
    %126 = arith.addf %125, %124 : vector<8x32xf32>
    %127 = arith.divf %125, %126 : vector<8x32xf32>
    %128 = vector.extract_strided_slice %121 {offsets = [0, 128], sizes = [8, 32], strides = [1, 1]} : vector<8x512xf32> to vector<8x32xf32>
    %129 = arith.negf %128 : vector<8x32xf32>
    %130 = math.exp %129 : vector<8x32xf32>
    %cst_35 = arith.constant 1.000000e+00 : f32
    %131 = vector.broadcast %cst_35 : f32 to vector<8x32xf32>
    %132 = arith.addf %131, %130 : vector<8x32xf32>
    %133 = arith.divf %131, %132 : vector<8x32xf32>
    %134 = vector.extract_strided_slice %121 {offsets = [0, 256], sizes = [8, 32], strides = [1, 1]} : vector<8x512xf32> to vector<8x32xf32>
    %135 = math.tanh %134 : vector<8x32xf32>
    %136 = vector.extract_strided_slice %121 {offsets = [0, 384], sizes = [8, 32], strides = [1, 1]} : vector<8x512xf32> to vector<8x32xf32>
    %137 = arith.negf %136 : vector<8x32xf32>
    %138 = math.exp %137 : vector<8x32xf32>
    %cst_36 = arith.constant 1.000000e+00 : f32
    %139 = vector.broadcast %cst_36 : f32 to vector<8x32xf32>
    %140 = arith.addf %139, %138 : vector<8x32xf32>
    %141 = arith.divf %139, %140 : vector<8x32xf32>
    %142 = arith.mulf %133, %109 : vector<8x32xf32>
    %143 = arith.mulf %127, %135 : vector<8x32xf32>
    %144 = arith.addf %142, %143 : vector<8x32xf32>
    %145 = math.tanh %144 : vector<8x32xf32>
    %146 = arith.mulf %141, %145 : vector<8x32xf32>
    %147 = arith.truncf %146 : vector<8x32xf32> to vector<8x32xbf16>
    %148 = arith.index_cast %116 : i32 to index
    %c0_37 = arith.constant 0 : index
    %149 = vector.load %arg12[%148, %c0_37] : memref<64x32xbf16, #tpu.memory_space<vmem>>, vector<8x32xbf16>
    tpu.vector_store %arg12[%148, %c0_37], %147 {strides = array<i32>} : memref<64x32xbf16, #tpu.memory_space<vmem>>, vector<8x32xbf16>,
    %c4_i32 = arith.constant 4 : i32
    %c8_i32_38 = arith.constant 8 : i32
    %150 = arith.muli %c4_i32, %c8_i32_38 : i32
    %151 = tpu.assume_multiple %150, 8 : i32
    %152 = arith.truncf %146 : vector<8x32xf32> to vector<8x32xbf16>
    %cst_39 = arith.constant dense<0.000000e+00> : vector<8x512xf32>
    %153 = tpu.matmul %152, %8, %cst_39 {dimension_numbers = #tpu.dot_dimension_numbers<[1], [0], [0], [1], [0, 0, 1, 1], [], []>} : vector<8x32xbf16>, vector<32x512xbf16>, vector<8x512xf32> -> vector<8x512xf32>
    %154 = arith.index_cast %151 : i32 to index
    %c0_40 = arith.constant 0 : index
    %155 = vector.load %arg11[%154, %c0_40] : memref<64x512xf32, #tpu.memory_space<vmem>>, vector<8x512xf32>
    %156 = arith.addf %155, %153 : vector<8x512xf32>
    %157 = vector.extract_strided_slice %156 {offsets = [0, 0], sizes = [8, 32], strides = [1, 1]} : vector<8x512xf32> to vector<8x32xf32>
    %158 = arith.negf %157 : vector<8x32xf32>
    %159 = math.exp %158 : vector<8x32xf32>
    %cst_41 = arith.constant 1.000000e+00 : f32
    %160 = vector.broadcast %cst_41 : f32 to vector<8x32xf32>
    %161 = arith.addf %160, %159 : vector<8x32xf32>
    %162 = arith.divf %160, %161 : vector<8x32xf32>
    %163 = vector.extract_strided_slice %156 {offsets = [0, 128], sizes = [8, 32], strides = [1, 1]} : vector<8x512xf32> to vector<8x32xf32>
    %164 = arith.negf %163 : vector<8x32xf32>
    %165 = math.exp %164 : vector<8x32xf32>
    %cst_42 = arith.constant 1.000000e+00 : f32
    %166 = vector.broadcast %cst_42 : f32 to vector<8x32xf32>
    %167 = arith.addf %166, %165 : vector<8x32xf32>
    %168 = arith.divf %166, %167 : vector<8x32xf32>
    %169 = vector.extract_strided_slice %156 {offsets = [0, 256], sizes = [8, 32], strides = [1, 1]} : vector<8x512xf32> to vector<8x32xf32>
    %170 = math.tanh %169 : vector<8x32xf32>
    %171 = vector.extract_strided_slice %156 {offsets = [0, 384], sizes = [8, 32], strides = [1, 1]} : vector<8x512xf32> to vector<8x32xf32>
    %172 = arith.negf %171 : vector<8x32xf32>
    %173 = math.exp %172 : vector<8x32xf32>
    %cst_43 = arith.constant 1.000000e+00 : f32
    %174 = vector.broadcast %cst_43 : f32 to vector<8x32xf32>
    %175 = arith.addf %174, %173 : vector<8x32xf32>
    %176 = arith.divf %174, %175 : vector<8x32xf32>
    %177 = arith.mulf %168, %144 : vector<8x32xf32>
    %178 = arith.mulf %162, %170 : vector<8x32xf32>
    %179 = arith.addf %177, %178 : vector<8x32xf32>
    %180 = math.tanh %179 : vector<8x32xf32>
    %181 = arith.mulf %176, %180 : vector<8x32xf32>
    %182 = arith.truncf %181 : vector<8x32xf32> to vector<8x32xbf16>
    %183 = arith.index_cast %151 : i32 to index
    %c0_44 = arith.constant 0 : index
    %184 = vector.load %arg12[%183, %c0_44] : memref<64x32xbf16, #tpu.memory_space<vmem>>, vector<8x32xbf16>
    tpu.vector_store %arg12[%183, %c0_44], %182 {strides = array<i32>} : memref<64x32xbf16, #tpu.memory_space<vmem>>, vector<8x32xbf16>,
    %c5_i32 = arith.constant 5 : i32
    %c8_i32_45 = arith.constant 8 : i32
    %185 = arith.muli %c5_i32, %c8_i32_45 : i32
    %186 = tpu.assume_multiple %185, 8 : i32
    %187 = arith.truncf %181 : vector<8x32xf32> to vector<8x32xbf16>
    %cst_46 = arith.constant dense<0.000000e+00> : vector<8x512xf32>
    %188 = tpu.matmul %187, %8, %cst_46 {dimension_numbers = #tpu.dot_dimension_numbers<[1], [0], [0], [1], [0, 0, 1, 1], [], []>} : vector<8x32xbf16>, vector<32x512xbf16>, vector<8x512xf32> -> vector<8x512xf32>
    %189 = arith.index_cast %186 : i32 to index
    %c0_47 = arith.constant 0 : index
    %190 = vector.load %arg11[%189, %c0_47] : memref<64x512xf32, #tpu.memory_space<vmem>>, vector<8x512xf32>
    %191 = arith.addf %190, %188 : vector<8x512xf32>
    %192 = vector.extract_strided_slice %191 {offsets = [0, 0], sizes = [8, 32], strides = [1, 1]} : vector<8x512xf32> to vector<8x32xf32>
    %193 = arith.negf %192 : vector<8x32xf32>
    %194 = math.exp %193 : vector<8x32xf32>
    %cst_48 = arith.constant 1.000000e+00 : f32
    %195 = vector.broadcast %cst_48 : f32 to vector<8x32xf32>
    %196 = arith.addf %195, %194 : vector<8x32xf32>
    %197 = arith.divf %195, %196 : vector<8x32xf32>
    %198 = vector.extract_strided_slice %191 {offsets = [0, 128], sizes = [8, 32], strides = [1, 1]} : vector<8x512xf32> to vector<8x32xf32>
    %199 = arith.negf %198 : vector<8x32xf32>
    %200 = math.exp %199 : vector<8x32xf32>
    %cst_49 = arith.constant 1.000000e+00 : f32
    %201 = vector.broadcast %cst_49 : f32 to vector<8x32xf32>
    %202 = arith.addf %201, %200 : vector<8x32xf32>
    %203 = arith.divf %201, %202 : vector<8x32xf32>
    %204 = vector.extract_strided_slice %191 {offsets = [0, 256], sizes = [8, 32], strides = [1, 1]} : vector<8x512xf32> to vector<8x32xf32>
    %205 = math.tanh %204 : vector<8x32xf32>
    %206 = vector.extract_strided_slice %191 {offsets = [0, 384], sizes = [8, 32], strides = [1, 1]} : vector<8x512xf32> to vector<8x32xf32>
    %207 = arith.negf %206 : vector<8x32xf32>
    %208 = math.exp %207 : vector<8x32xf32>
    %cst_50 = arith.constant 1.000000e+00 : f32
    %209 = vector.broadcast %cst_50 : f32 to vector<8x32xf32>
    %210 = arith.addf %209, %208 : vector<8x32xf32>
    %211 = arith.divf %209, %210 : vector<8x32xf32>
    %212 = arith.mulf %203, %179 : vector<8x32xf32>
    %213 = arith.mulf %197, %205 : vector<8x32xf32>
    %214 = arith.addf %212, %213 : vector<8x32xf32>
    %215 = math.tanh %214 : vector<8x32xf32>
    %216 = arith.mulf %211, %215 : vector<8x32xf32>
    %217 = arith.truncf %216 : vector<8x32xf32> to vector<8x32xbf16>
    %218 = arith.index_cast %186 : i32 to index
    %c0_51 = arith.constant 0 : index
    %219 = vector.load %arg12[%218, %c0_51] : memref<64x32xbf16, #tpu.memory_space<vmem>>, vector<8x32xbf16>
    tpu.vector_store %arg12[%218, %c0_51], %217 {strides = array<i32>} : memref<64x32xbf16, #tpu.memory_space<vmem>>, vector<8x32xbf16>,
    %c6_i32 = arith.constant 6 : i32
    %c8_i32_52 = arith.constant 8 : i32
    %220 = arith.muli %c6_i32, %c8_i32_52 : i32
    %221 = tpu.assume_multiple %220, 8 : i32
    %222 = arith.truncf %216 : vector<8x32xf32> to vector<8x32xbf16>
    %cst_53 = arith.constant dense<0.000000e+00> : vector<8x512xf32>
    %223 = tpu.matmul %222, %8, %cst_53 {dimension_numbers = #tpu.dot_dimension_numbers<[1], [0], [0], [1], [0, 0, 1, 1], [], []>} : vector<8x32xbf16>, vector<32x512xbf16>, vector<8x512xf32> -> vector<8x512xf32>
    %224 = arith.index_cast %221 : i32 to index
    %c0_54 = arith.constant 0 : index
    %225 = vector.load %arg11[%224, %c0_54] : memref<64x512xf32, #tpu.memory_space<vmem>>, vector<8x512xf32>
    %226 = arith.addf %225, %223 : vector<8x512xf32>
    %227 = vector.extract_strided_slice %226 {offsets = [0, 0], sizes = [8, 32], strides = [1, 1]} : vector<8x512xf32> to vector<8x32xf32>
    %228 = arith.negf %227 : vector<8x32xf32>
    %229 = math.exp %228 : vector<8x32xf32>
    %cst_55 = arith.constant 1.000000e+00 : f32
    %230 = vector.broadcast %cst_55 : f32 to vector<8x32xf32>
    %231 = arith.addf %230, %229 : vector<8x32xf32>
    %232 = arith.divf %230, %231 : vector<8x32xf32>
    %233 = vector.extract_strided_slice %226 {offsets = [0, 128], sizes = [8, 32], strides = [1, 1]} : vector<8x512xf32> to vector<8x32xf32>
    %234 = arith.negf %233 : vector<8x32xf32>
    %235 = math.exp %234 : vector<8x32xf32>
    %cst_56 = arith.constant 1.000000e+00 : f32
    %236 = vector.broadcast %cst_56 : f32 to vector<8x32xf32>
    %237 = arith.addf %236, %235 : vector<8x32xf32>
    %238 = arith.divf %236, %237 : vector<8x32xf32>
    %239 = vector.extract_strided_slice %226 {offsets = [0, 256], sizes = [8, 32], strides = [1, 1]} : vector<8x512xf32> to vector<8x32xf32>
    %240 = math.tanh %239 : vector<8x32xf32>
    %241 = vector.extract_strided_slice %226 {offsets = [0, 384], sizes = [8, 32], strides = [1, 1]} : vector<8x512xf32> to vector<8x32xf32>
    %242 = arith.negf %241 : vector<8x32xf32>
    %243 = math.exp %242 : vector<8x32xf32>
    %cst_57 = arith.constant 1.000000e+00 : f32
    %244 = vector.broadcast %cst_57 : f32 to vector<8x32xf32>
    %245 = arith.addf %244, %243 : vector<8x32xf32>
    %246 = arith.divf %244, %245 : vector<8x32xf32>
    %247 = arith.mulf %238, %214 : vector<8x32xf32>
    %248 = arith.mulf %232, %240 : vector<8x32xf32>
    %249 = arith.addf %247, %248 : vector<8x32xf32>
    %250 = math.tanh %249 : vector<8x32xf32>
    %251 = arith.mulf %246, %250 : vector<8x32xf32>
    %252 = arith.truncf %251 : vector<8x32xf32> to vector<8x32xbf16>
    %253 = arith.index_cast %221 : i32 to index
    %c0_58 = arith.constant 0 : index
    %254 = vector.load %arg12[%253, %c0_58] : memref<64x32xbf16, #tpu.memory_space<vmem>>, vector<8x32xbf16>
    tpu.vector_store %arg12[%253, %c0_58], %252 {strides = array<i32>} : memref<64x32xbf16, #tpu.memory_space<vmem>>, vector<8x32xbf16>,
    %c7_i32 = arith.constant 7 : i32
    %c8_i32_59 = arith.constant 8 : i32
    %255 = arith.muli %c7_i32, %c8_i32_59 : i32
    %256 = tpu.assume_multiple %255, 8 : i32
    %257 = arith.truncf %251 : vector<8x32xf32> to vector<8x32xbf16>
    %cst_60 = arith.constant dense<0.000000e+00> : vector<8x512xf32>
    %258 = tpu.matmul %257, %8, %cst_60 {dimension_numbers = #tpu.dot_dimension_numbers<[1], [0], [0], [1], [0, 0, 1, 1], [], []>} : vector<8x32xbf16>, vector<32x512xbf16>, vector<8x512xf32> -> vector<8x512xf32>
    %259 = arith.index_cast %256 : i32 to index
    %c0_61 = arith.constant 0 : index
    %260 = vector.load %arg11[%259, %c0_61] : memref<64x512xf32, #tpu.memory_space<vmem>>, vector<8x512xf32>
    %261 = arith.addf %260, %258 : vector<8x512xf32>
    %262 = vector.extract_strided_slice %261 {offsets = [0, 0], sizes = [8, 32], strides = [1, 1]} : vector<8x512xf32> to vector<8x32xf32>
    %263 = arith.negf %262 : vector<8x32xf32>
    %264 = math.exp %263 : vector<8x32xf32>
    %cst_62 = arith.constant 1.000000e+00 : f32
    %265 = vector.broadcast %cst_62 : f32 to vector<8x32xf32>
    %266 = arith.addf %265, %264 : vector<8x32xf32>
    %267 = arith.divf %265, %266 : vector<8x32xf32>
    %268 = vector.extract_strided_slice %261 {offsets = [0, 128], sizes = [8, 32], strides = [1, 1]} : vector<8x512xf32> to vector<8x32xf32>
    %269 = arith.negf %268 : vector<8x32xf32>
    %270 = math.exp %269 : vector<8x32xf32>
    %cst_63 = arith.constant 1.000000e+00 : f32
    %271 = vector.broadcast %cst_63 : f32 to vector<8x32xf32>
    %272 = arith.addf %271, %270 : vector<8x32xf32>
    %273 = arith.divf %271, %272 : vector<8x32xf32>
    %274 = vector.extract_strided_slice %261 {offsets = [0, 256], sizes = [8, 32], strides = [1, 1]} : vector<8x512xf32> to vector<8x32xf32>
    %275 = math.tanh %274 : vector<8x32xf32>
    %276 = vector.extract_strided_slice %261 {offsets = [0, 384], sizes = [8, 32], strides = [1, 1]} : vector<8x512xf32> to vector<8x32xf32>
    %277 = arith.negf %276 : vector<8x32xf32>
    %278 = math.exp %277 : vector<8x32xf32>
    %cst_64 = arith.constant 1.000000e+00 : f32
    %279 = vector.broadcast %cst_64 : f32 to vector<8x32xf32>
    %280 = arith.addf %279, %278 : vector<8x32xf32>
    %281 = arith.divf %279, %280 : vector<8x32xf32>
    %282 = arith.mulf %273, %249 : vector<8x32xf32>
    %283 = arith.mulf %267, %275 : vector<8x32xf32>
    %284 = arith.addf %282, %283 : vector<8x32xf32>
    %285 = math.tanh %284 : vector<8x32xf32>
    %286 = arith.mulf %281, %285 : vector<8x32xf32>
    %287 = arith.truncf %286 : vector<8x32xf32> to vector<8x32xbf16>
    %288 = arith.index_cast %256 : i32 to index
    %c0_65 = arith.constant 0 : index
    %289 = vector.load %arg12[%288, %c0_65] : memref<64x32xbf16, #tpu.memory_space<vmem>>, vector<8x32xbf16>
    tpu.vector_store %arg12[%288, %c0_65], %287 {strides = array<i32>} : memref<64x32xbf16, #tpu.memory_space<vmem>>, vector<8x32xbf16>,
    %c8_i32_66 = arith.constant 8 : i32
    %c0_67 = arith.constant 0 : index
    %c0_68 = arith.constant 0 : index
    %290 = vector.load %arg12[%c0_67, %c0_68] : memref<64x32xbf16, #tpu.memory_space<vmem>>, vector<64x32xbf16>
    %c0_69 = arith.constant 0 : index
    %c0_70 = arith.constant 0 : index
    %291 = vector.load %arg5[%c0_69, %c0_70] : memref<32x512xbf16, #tpu.memory_space<vmem>>, vector<32x512xbf16>
    %cst_71 = arith.constant dense<0.000000e+00> : vector<64x512xf32>
    %292 = tpu.matmul %290, %291, %cst_71 {dimension_numbers = #tpu.dot_dimension_numbers<[1], [0], [0], [1], [0, 0, 1, 1], [], []>} : vector<64x32xbf16>, vector<32x512xbf16>, vector<64x512xf32> -> vector<64x512xf32>
    %c0_72 = arith.constant 0 : index
    %c0_73 = arith.constant 0 : index
    %293 = vector.load %arg7[%c0_72, %c0_73] : memref<1x512xf32, #tpu.memory_space<vmem>>, vector<1x512xf32>
    %294 = vector.broadcast %293 : vector<1x512xf32> to vector<64x512xf32>
    %295 = arith.addf %292, %294 : vector<64x512xf32>
    %c0_74 = arith.constant 0 : index
    %c0_75 = arith.constant 0 : index
    %296 = vector.load %arg11[%c0_74, %c0_75] : memref<64x512xf32, #tpu.memory_space<vmem>>, vector<64x512xf32>
    tpu.vector_store %arg11[%c0_74, %c0_75], %295 {strides = array<i32>} : memref<64x512xf32, #tpu.memory_space<vmem>>, vector<64x512xf32>,
    %c0_76 = arith.constant 0 : index
    %c0_77 = arith.constant 0 : index
    %297 = vector.load %arg6[%c0_76, %c0_77] : memref<32x512xbf16, #tpu.memory_space<vmem>>, vector<32x512xbf16>
    %cst_78 = arith.constant 0.000000e+00 : f32
    %298 = vector.broadcast %cst_78 : f32 to vector<8x32xf32>
    %c0_i32_79 = arith.constant 0 : i32
    %c8_i32_80 = arith.constant 8 : i32
    %299 = arith.muli %c0_i32_79, %c8_i32_80 : i32
    %300 = tpu.assume_multiple %299, 8 : i32
    %301 = arith.truncf %298 : vector<8x32xf32> to vector<8x32xbf16>
    %cst_81 = arith.constant dense<0.000000e+00> : vector<8x512xf32>
    %302 = tpu.matmul %301, %297, %cst_81 {dimension_numbers = #tpu.dot_dimension_numbers<[1], [0], [0], [1], [0, 0, 1, 1], [], []>} : vector<8x32xbf16>, vector<32x512xbf16>, vector<8x512xf32> -> vector<8x512xf32>
    %303 = arith.index_cast %300 : i32 to index
    %c0_82 = arith.constant 0 : index
    %304 = vector.load %arg11[%303, %c0_82] : memref<64x512xf32, #tpu.memory_space<vmem>>, vector<8x512xf32>
    %305 = arith.addf %304, %302 : vector<8x512xf32>
    %306 = vector.extract_strided_slice %305 {offsets = [0, 0], sizes = [8, 32], strides = [1, 1]} : vector<8x512xf32> to vector<8x32xf32>
    %307 = arith.negf %306 : vector<8x32xf32>
    %308 = math.exp %307 : vector<8x32xf32>
    %cst_83 = arith.constant 1.000000e+00 : f32
    %309 = vector.broadcast %cst_83 : f32 to vector<8x32xf32>
    %310 = arith.addf %309, %308 : vector<8x32xf32>
    %311 = arith.divf %309, %310 : vector<8x32xf32>
    %312 = vector.extract_strided_slice %305 {offsets = [0, 128], sizes = [8, 32], strides = [1, 1]} : vector<8x512xf32> to vector<8x32xf32>
    %313 = arith.negf %312 : vector<8x32xf32>
    %314 = math.exp %313 : vector<8x32xf32>
    %cst_84 = arith.constant 1.000000e+00 : f32
    %315 = vector.broadcast %cst_84 : f32 to vector<8x32xf32>
    %316 = arith.addf %315, %314 : vector<8x32xf32>
    %317 = arith.divf %315, %316 : vector<8x32xf32>
    %318 = vector.extract_strided_slice %305 {offsets = [0, 256], sizes = [8, 32], strides = [1, 1]} : vector<8x512xf32> to vector<8x32xf32>
    %319 = math.tanh %318 : vector<8x32xf32>
    %320 = vector.extract_strided_slice %305 {offsets = [0, 384], sizes = [8, 32], strides = [1, 1]} : vector<8x512xf32> to vector<8x32xf32>
    %321 = arith.negf %320 : vector<8x32xf32>
    %322 = math.exp %321 : vector<8x32xf32>
    %cst_85 = arith.constant 1.000000e+00 : f32
    %323 = vector.broadcast %cst_85 : f32 to vector<8x32xf32>
    %324 = arith.addf %323, %322 : vector<8x32xf32>
    %325 = arith.divf %323, %324 : vector<8x32xf32>
    %326 = arith.mulf %317, %298 : vector<8x32xf32>
    %327 = arith.mulf %311, %319 : vector<8x32xf32>
    %328 = arith.addf %326, %327 : vector<8x32xf32>
    %329 = math.tanh %328 : vector<8x32xf32>
    %330 = arith.mulf %325, %329 : vector<8x32xf32>
    %c1_i32_86 = arith.constant 1 : i32
    %c8_i32_87 = arith.constant 8 : i32
    %331 = arith.muli %c1_i32_86, %c8_i32_87 : i32
    %332 = tpu.assume_multiple %331, 8 : i32
    %333 = arith.truncf %330 : vector<8x32xf32> to vector<8x32xbf16>
    %cst_88 = arith.constant dense<0.000000e+00> : vector<8x512xf32>
    %334 = tpu.matmul %333, %297, %cst_88 {dimension_numbers = #tpu.dot_dimension_numbers<[1], [0], [0], [1], [0, 0, 1, 1], [], []>} : vector<8x32xbf16>, vector<32x512xbf16>, vector<8x512xf32> -> vector<8x512xf32>
    %335 = arith.index_cast %332 : i32 to index
    %c0_89 = arith.constant 0 : index
    %336 = vector.load %arg11[%335, %c0_89] : memref<64x512xf32, #tpu.memory_space<vmem>>, vector<8x512xf32>
    %337 = arith.addf %336, %334 : vector<8x512xf32>
    %338 = vector.extract_strided_slice %337 {offsets = [0, 0], sizes = [8, 32], strides = [1, 1]} : vector<8x512xf32> to vector<8x32xf32>
    %339 = arith.negf %338 : vector<8x32xf32>
    %340 = math.exp %339 : vector<8x32xf32>
    %cst_90 = arith.constant 1.000000e+00 : f32
    %341 = vector.broadcast %cst_90 : f32 to vector<8x32xf32>
    %342 = arith.addf %341, %340 : vector<8x32xf32>
    %343 = arith.divf %341, %342 : vector<8x32xf32>
    %344 = vector.extract_strided_slice %337 {offsets = [0, 128], sizes = [8, 32], strides = [1, 1]} : vector<8x512xf32> to vector<8x32xf32>
    %345 = arith.negf %344 : vector<8x32xf32>
    %346 = math.exp %345 : vector<8x32xf32>
    %cst_91 = arith.constant 1.000000e+00 : f32
    %347 = vector.broadcast %cst_91 : f32 to vector<8x32xf32>
    %348 = arith.addf %347, %346 : vector<8x32xf32>
    %349 = arith.divf %347, %348 : vector<8x32xf32>
    %350 = vector.extract_strided_slice %337 {offsets = [0, 256], sizes = [8, 32], strides = [1, 1]} : vector<8x512xf32> to vector<8x32xf32>
    %351 = math.tanh %350 : vector<8x32xf32>
    %352 = vector.extract_strided_slice %337 {offsets = [0, 384], sizes = [8, 32], strides = [1, 1]} : vector<8x512xf32> to vector<8x32xf32>
    %353 = arith.negf %352 : vector<8x32xf32>
    %354 = math.exp %353 : vector<8x32xf32>
    %cst_92 = arith.constant 1.000000e+00 : f32
    %355 = vector.broadcast %cst_92 : f32 to vector<8x32xf32>
    %356 = arith.addf %355, %354 : vector<8x32xf32>
    %357 = arith.divf %355, %356 : vector<8x32xf32>
    %358 = arith.mulf %349, %328 : vector<8x32xf32>
    %359 = arith.mulf %343, %351 : vector<8x32xf32>
    %360 = arith.addf %358, %359 : vector<8x32xf32>
    %361 = math.tanh %360 : vector<8x32xf32>
    %362 = arith.mulf %357, %361 : vector<8x32xf32>
    %c2_i32_93 = arith.constant 2 : i32
    %c8_i32_94 = arith.constant 8 : i32
    %363 = arith.muli %c2_i32_93, %c8_i32_94 : i32
    %364 = tpu.assume_multiple %363, 8 : i32
    %365 = arith.truncf %362 : vector<8x32xf32> to vector<8x32xbf16>
    %cst_95 = arith.constant dense<0.000000e+00> : vector<8x512xf32>
    %366 = tpu.matmul %365, %297, %cst_95 {dimension_numbers = #tpu.dot_dimension_numbers<[1], [0], [0], [1], [0, 0, 1, 1], [], []>} : vector<8x32xbf16>, vector<32x512xbf16>, vector<8x512xf32> -> vector<8x512xf32>
    %367 = arith.index_cast %364 : i32 to index
    %c0_96 = arith.constant 0 : index
    %368 = vector.load %arg11[%367, %c0_96] : memref<64x512xf32, #tpu.memory_space<vmem>>, vector<8x512xf32>
    %369 = arith.addf %368, %366 : vector<8x512xf32>
    %370 = vector.extract_strided_slice %369 {offsets = [0, 0], sizes = [8, 32], strides = [1, 1]} : vector<8x512xf32> to vector<8x32xf32>
    %371 = arith.negf %370 : vector<8x32xf32>
    %372 = math.exp %371 : vector<8x32xf32>
    %cst_97 = arith.constant 1.000000e+00 : f32
    %373 = vector.broadcast %cst_97 : f32 to vector<8x32xf32>
    %374 = arith.addf %373, %372 : vector<8x32xf32>
    %375 = arith.divf %373, %374 : vector<8x32xf32>
    %376 = vector.extract_strided_slice %369 {offsets = [0, 128], sizes = [8, 32], strides = [1, 1]} : vector<8x512xf32> to vector<8x32xf32>
    %377 = arith.negf %376 : vector<8x32xf32>
    %378 = math.exp %377 : vector<8x32xf32>
    %cst_98 = arith.constant 1.000000e+00 : f32
    %379 = vector.broadcast %cst_98 : f32 to vector<8x32xf32>
    %380 = arith.addf %379, %378 : vector<8x32xf32>
    %381 = arith.divf %379, %380 : vector<8x32xf32>
    %382 = vector.extract_strided_slice %369 {offsets = [0, 256], sizes = [8, 32], strides = [1, 1]} : vector<8x512xf32> to vector<8x32xf32>
    %383 = math.tanh %382 : vector<8x32xf32>
    %384 = vector.extract_strided_slice %369 {offsets = [0, 384], sizes = [8, 32], strides = [1, 1]} : vector<8x512xf32> to vector<8x32xf32>
    %385 = arith.negf %384 : vector<8x32xf32>
    %386 = math.exp %385 : vector<8x32xf32>
    %cst_99 = arith.constant 1.000000e+00 : f32
    %387 = vector.broadcast %cst_99 : f32 to vector<8x32xf32>
    %388 = arith.addf %387, %386 : vector<8x32xf32>
    %389 = arith.divf %387, %388 : vector<8x32xf32>
    %390 = arith.mulf %381, %360 : vector<8x32xf32>
    %391 = arith.mulf %375, %383 : vector<8x32xf32>
    %392 = arith.addf %390, %391 : vector<8x32xf32>
    %393 = math.tanh %392 : vector<8x32xf32>
    %394 = arith.mulf %389, %393 : vector<8x32xf32>
    %c3_i32_100 = arith.constant 3 : i32
    %c8_i32_101 = arith.constant 8 : i32
    %395 = arith.muli %c3_i32_100, %c8_i32_101 : i32
    %396 = tpu.assume_multiple %395, 8 : i32
    %397 = arith.truncf %394 : vector<8x32xf32> to vector<8x32xbf16>
    %cst_102 = arith.constant dense<0.000000e+00> : vector<8x512xf32>
    %398 = tpu.matmul %397, %297, %cst_102 {dimension_numbers = #tpu.dot_dimension_numbers<[1], [0], [0], [1], [0, 0, 1, 1], [], []>} : vector<8x32xbf16>, vector<32x512xbf16>, vector<8x512xf32> -> vector<8x512xf32>
    %399 = arith.index_cast %396 : i32 to index
    %c0_103 = arith.constant 0 : index
    %400 = vector.load %arg11[%399, %c0_103] : memref<64x512xf32, #tpu.memory_space<vmem>>, vector<8x512xf32>
    %401 = arith.addf %400, %398 : vector<8x512xf32>
    %402 = vector.extract_strided_slice %401 {offsets = [0, 0], sizes = [8, 32], strides = [1, 1]} : vector<8x512xf32> to vector<8x32xf32>
    %403 = arith.negf %402 : vector<8x32xf32>
    %404 = math.exp %403 : vector<8x32xf32>
    %cst_104 = arith.constant 1.000000e+00 : f32
    %405 = vector.broadcast %cst_104 : f32 to vector<8x32xf32>
    %406 = arith.addf %405, %404 : vector<8x32xf32>
    %407 = arith.divf %405, %406 : vector<8x32xf32>
    %408 = vector.extract_strided_slice %401 {offsets = [0, 128], sizes = [8, 32], strides = [1, 1]} : vector<8x512xf32> to vector<8x32xf32>
    %409 = arith.negf %408 : vector<8x32xf32>
    %410 = math.exp %409 : vector<8x32xf32>
    %cst_105 = arith.constant 1.000000e+00 : f32
    %411 = vector.broadcast %cst_105 : f32 to vector<8x32xf32>
    %412 = arith.addf %411, %410 : vector<8x32xf32>
    %413 = arith.divf %411, %412 : vector<8x32xf32>
    %414 = vector.extract_strided_slice %401 {offsets = [0, 256], sizes = [8, 32], strides = [1, 1]} : vector<8x512xf32> to vector<8x32xf32>
    %415 = math.tanh %414 : vector<8x32xf32>
    %416 = vector.extract_strided_slice %401 {offsets = [0, 384], sizes = [8, 32], strides = [1, 1]} : vector<8x512xf32> to vector<8x32xf32>
    %417 = arith.negf %416 : vector<8x32xf32>
    %418 = math.exp %417 : vector<8x32xf32>
    %cst_106 = arith.constant 1.000000e+00 : f32
    %419 = vector.broadcast %cst_106 : f32 to vector<8x32xf32>
    %420 = arith.addf %419, %418 : vector<8x32xf32>
    %421 = arith.divf %419, %420 : vector<8x32xf32>
    %422 = arith.mulf %413, %392 : vector<8x32xf32>
    %423 = arith.mulf %407, %415 : vector<8x32xf32>
    %424 = arith.addf %422, %423 : vector<8x32xf32>
    %425 = math.tanh %424 : vector<8x32xf32>
    %426 = arith.mulf %421, %425 : vector<8x32xf32>
    %c4_i32_107 = arith.constant 4 : i32
    %c8_i32_108 = arith.constant 8 : i32
    %427 = arith.muli %c4_i32_107, %c8_i32_108 : i32
    %428 = tpu.assume_multiple %427, 8 : i32
    %429 = arith.truncf %426 : vector<8x32xf32> to vector<8x32xbf16>
    %cst_109 = arith.constant dense<0.000000e+00> : vector<8x512xf32>
    %430 = tpu.matmul %429, %297, %cst_109 {dimension_numbers = #tpu.dot_dimension_numbers<[1], [0], [0], [1], [0, 0, 1, 1], [], []>} : vector<8x32xbf16>, vector<32x512xbf16>, vector<8x512xf32> -> vector<8x512xf32>
    %431 = arith.index_cast %428 : i32 to index
    %c0_110 = arith.constant 0 : index
    %432 = vector.load %arg11[%431, %c0_110] : memref<64x512xf32, #tpu.memory_space<vmem>>, vector<8x512xf32>
    %433 = arith.addf %432, %430 : vector<8x512xf32>
    %434 = vector.extract_strided_slice %433 {offsets = [0, 0], sizes = [8, 32], strides = [1, 1]} : vector<8x512xf32> to vector<8x32xf32>
    %435 = arith.negf %434 : vector<8x32xf32>
    %436 = math.exp %435 : vector<8x32xf32>
    %cst_111 = arith.constant 1.000000e+00 : f32
    %437 = vector.broadcast %cst_111 : f32 to vector<8x32xf32>
    %438 = arith.addf %437, %436 : vector<8x32xf32>
    %439 = arith.divf %437, %438 : vector<8x32xf32>
    %440 = vector.extract_strided_slice %433 {offsets = [0, 128], sizes = [8, 32], strides = [1, 1]} : vector<8x512xf32> to vector<8x32xf32>
    %441 = arith.negf %440 : vector<8x32xf32>
    %442 = math.exp %441 : vector<8x32xf32>
    %cst_112 = arith.constant 1.000000e+00 : f32
    %443 = vector.broadcast %cst_112 : f32 to vector<8x32xf32>
    %444 = arith.addf %443, %442 : vector<8x32xf32>
    %445 = arith.divf %443, %444 : vector<8x32xf32>
    %446 = vector.extract_strided_slice %433 {offsets = [0, 256], sizes = [8, 32], strides = [1, 1]} : vector<8x512xf32> to vector<8x32xf32>
    %447 = math.tanh %446 : vector<8x32xf32>
    %448 = vector.extract_strided_slice %433 {offsets = [0, 384], sizes = [8, 32], strides = [1, 1]} : vector<8x512xf32> to vector<8x32xf32>
    %449 = arith.negf %448 : vector<8x32xf32>
    %450 = math.exp %449 : vector<8x32xf32>
    %cst_113 = arith.constant 1.000000e+00 : f32
    %451 = vector.broadcast %cst_113 : f32 to vector<8x32xf32>
    %452 = arith.addf %451, %450 : vector<8x32xf32>
    %453 = arith.divf %451, %452 : vector<8x32xf32>
    %454 = arith.mulf %445, %424 : vector<8x32xf32>
    %455 = arith.mulf %439, %447 : vector<8x32xf32>
    %456 = arith.addf %454, %455 : vector<8x32xf32>
    %457 = math.tanh %456 : vector<8x32xf32>
    %458 = arith.mulf %453, %457 : vector<8x32xf32>
    %c5_i32_114 = arith.constant 5 : i32
    %c8_i32_115 = arith.constant 8 : i32
    %459 = arith.muli %c5_i32_114, %c8_i32_115 : i32
    %460 = tpu.assume_multiple %459, 8 : i32
    %461 = arith.truncf %458 : vector<8x32xf32> to vector<8x32xbf16>
    %cst_116 = arith.constant dense<0.000000e+00> : vector<8x512xf32>
    %462 = tpu.matmul %461, %297, %cst_116 {dimension_numbers = #tpu.dot_dimension_numbers<[1], [0], [0], [1], [0, 0, 1, 1], [], []>} : vector<8x32xbf16>, vector<32x512xbf16>, vector<8x512xf32> -> vector<8x512xf32>
    %463 = arith.index_cast %460 : i32 to index
    %c0_117 = arith.constant 0 : index
    %464 = vector.load %arg11[%463, %c0_117] : memref<64x512xf32, #tpu.memory_space<vmem>>, vector<8x512xf32>
    %465 = arith.addf %464, %462 : vector<8x512xf32>
    %466 = vector.extract_strided_slice %465 {offsets = [0, 0], sizes = [8, 32], strides = [1, 1]} : vector<8x512xf32> to vector<8x32xf32>
    %467 = arith.negf %466 : vector<8x32xf32>
    %468 = math.exp %467 : vector<8x32xf32>
    %cst_118 = arith.constant 1.000000e+00 : f32
    %469 = vector.broadcast %cst_118 : f32 to vector<8x32xf32>
    %470 = arith.addf %469, %468 : vector<8x32xf32>
    %471 = arith.divf %469, %470 : vector<8x32xf32>
    %472 = vector.extract_strided_slice %465 {offsets = [0, 128], sizes = [8, 32], strides = [1, 1]} : vector<8x512xf32> to vector<8x32xf32>
    %473 = arith.negf %472 : vector<8x32xf32>
    %474 = math.exp %473 : vector<8x32xf32>
    %cst_119 = arith.constant 1.000000e+00 : f32
    %475 = vector.broadcast %cst_119 : f32 to vector<8x32xf32>
    %476 = arith.addf %475, %474 : vector<8x32xf32>
    %477 = arith.divf %475, %476 : vector<8x32xf32>
    %478 = vector.extract_strided_slice %465 {offsets = [0, 256], sizes = [8, 32], strides = [1, 1]} : vector<8x512xf32> to vector<8x32xf32>
    %479 = math.tanh %478 : vector<8x32xf32>
    %480 = vector.extract_strided_slice %465 {offsets = [0, 384], sizes = [8, 32], strides = [1, 1]} : vector<8x512xf32> to vector<8x32xf32>
    %481 = arith.negf %480 : vector<8x32xf32>
    %482 = math.exp %481 : vector<8x32xf32>
    %cst_120 = arith.constant 1.000000e+00 : f32
    %483 = vector.broadcast %cst_120 : f32 to vector<8x32xf32>
    %484 = arith.addf %483, %482 : vector<8x32xf32>
    %485 = arith.divf %483, %484 : vector<8x32xf32>
    %486 = arith.mulf %477, %456 : vector<8x32xf32>
    %487 = arith.mulf %471, %479 : vector<8x32xf32>
    %488 = arith.addf %486, %487 : vector<8x32xf32>
    %489 = math.tanh %488 : vector<8x32xf32>
    %490 = arith.mulf %485, %489 : vector<8x32xf32>
    %c6_i32_121 = arith.constant 6 : i32
    %c8_i32_122 = arith.constant 8 : i32
    %491 = arith.muli %c6_i32_121, %c8_i32_122 : i32
    %492 = tpu.assume_multiple %491, 8 : i32
    %493 = arith.truncf %490 : vector<8x32xf32> to vector<8x32xbf16>
    %cst_123 = arith.constant dense<0.000000e+00> : vector<8x512xf32>
    %494 = tpu.matmul %493, %297, %cst_123 {dimension_numbers = #tpu.dot_dimension_numbers<[1], [0], [0], [1], [0, 0, 1, 1], [], []>} : vector<8x32xbf16>, vector<32x512xbf16>, vector<8x512xf32> -> vector<8x512xf32>
    %495 = arith.index_cast %492 : i32 to index
    %c0_124 = arith.constant 0 : index
    %496 = vector.load %arg11[%495, %c0_124] : memref<64x512xf32, #tpu.memory_space<vmem>>, vector<8x512xf32>
    %497 = arith.addf %496, %494 : vector<8x512xf32>
    %498 = vector.extract_strided_slice %497 {offsets = [0, 0], sizes = [8, 32], strides = [1, 1]} : vector<8x512xf32> to vector<8x32xf32>
    %499 = arith.negf %498 : vector<8x32xf32>
    %500 = math.exp %499 : vector<8x32xf32>
    %cst_125 = arith.constant 1.000000e+00 : f32
    %501 = vector.broadcast %cst_125 : f32 to vector<8x32xf32>
    %502 = arith.addf %501, %500 : vector<8x32xf32>
    %503 = arith.divf %501, %502 : vector<8x32xf32>
    %504 = vector.extract_strided_slice %497 {offsets = [0, 128], sizes = [8, 32], strides = [1, 1]} : vector<8x512xf32> to vector<8x32xf32>
    %505 = arith.negf %504 : vector<8x32xf32>
    %506 = math.exp %505 : vector<8x32xf32>
    %cst_126 = arith.constant 1.000000e+00 : f32
    %507 = vector.broadcast %cst_126 : f32 to vector<8x32xf32>
    %508 = arith.addf %507, %506 : vector<8x32xf32>
    %509 = arith.divf %507, %508 : vector<8x32xf32>
    %510 = vector.extract_strided_slice %497 {offsets = [0, 256], sizes = [8, 32], strides = [1, 1]} : vector<8x512xf32> to vector<8x32xf32>
    %511 = math.tanh %510 : vector<8x32xf32>
    %512 = vector.extract_strided_slice %497 {offsets = [0, 384], sizes = [8, 32], strides = [1, 1]} : vector<8x512xf32> to vector<8x32xf32>
    %513 = arith.negf %512 : vector<8x32xf32>
    %514 = math.exp %513 : vector<8x32xf32>
    %cst_127 = arith.constant 1.000000e+00 : f32
    %515 = vector.broadcast %cst_127 : f32 to vector<8x32xf32>
    %516 = arith.addf %515, %514 : vector<8x32xf32>
    %517 = arith.divf %515, %516 : vector<8x32xf32>
    %518 = arith.mulf %509, %488 : vector<8x32xf32>
    %519 = arith.mulf %503, %511 : vector<8x32xf32>
    %520 = arith.addf %518, %519 : vector<8x32xf32>
    %521 = math.tanh %520 : vector<8x32xf32>
    %522 = arith.mulf %517, %521 : vector<8x32xf32>
    %c7_i32_128 = arith.constant 7 : i32
    %c8_i32_129 = arith.constant 8 : i32
    %523 = arith.muli %c7_i32_128, %c8_i32_129 : i32
    %524 = tpu.assume_multiple %523, 8 : i32
    %525 = arith.truncf %522 : vector<8x32xf32> to vector<8x32xbf16>
    %cst_130 = arith.constant dense<0.000000e+00> : vector<8x512xf32>
    %526 = tpu.matmul %525, %297, %cst_130 {dimension_numbers = #tpu.dot_dimension_numbers<[1], [0], [0], [1], [0, 0, 1, 1], [], []>} : vector<8x32xbf16>, vector<32x512xbf16>, vector<8x512xf32> -> vector<8x512xf32>
    %527 = arith.index_cast %524 : i32 to index
    %c0_131 = arith.constant 0 : index
    %528 = vector.load %arg11[%527, %c0_131] : memref<64x512xf32, #tpu.memory_space<vmem>>, vector<8x512xf32>
    %529 = arith.addf %528, %526 : vector<8x512xf32>
    %530 = vector.extract_strided_slice %529 {offsets = [0, 0], sizes = [8, 32], strides = [1, 1]} : vector<8x512xf32> to vector<8x32xf32>
    %531 = arith.negf %530 : vector<8x32xf32>
    %532 = math.exp %531 : vector<8x32xf32>
    %cst_132 = arith.constant 1.000000e+00 : f32
    %533 = vector.broadcast %cst_132 : f32 to vector<8x32xf32>
    %534 = arith.addf %533, %532 : vector<8x32xf32>
    %535 = arith.divf %533, %534 : vector<8x32xf32>
    %536 = vector.extract_strided_slice %529 {offsets = [0, 128], sizes = [8, 32], strides = [1, 1]} : vector<8x512xf32> to vector<8x32xf32>
    %537 = arith.negf %536 : vector<8x32xf32>
    %538 = math.exp %537 : vector<8x32xf32>
    %cst_133 = arith.constant 1.000000e+00 : f32
    %539 = vector.broadcast %cst_133 : f32 to vector<8x32xf32>
    %540 = arith.addf %539, %538 : vector<8x32xf32>
    %541 = arith.divf %539, %540 : vector<8x32xf32>
    %542 = vector.extract_strided_slice %529 {offsets = [0, 256], sizes = [8, 32], strides = [1, 1]} : vector<8x512xf32> to vector<8x32xf32>
    %543 = math.tanh %542 : vector<8x32xf32>
    %544 = vector.extract_strided_slice %529 {offsets = [0, 384], sizes = [8, 32], strides = [1, 1]} : vector<8x512xf32> to vector<8x32xf32>
    %545 = arith.negf %544 : vector<8x32xf32>
    %546 = math.exp %545 : vector<8x32xf32>
    %cst_134 = arith.constant 1.000000e+00 : f32
    %547 = vector.broadcast %cst_134 : f32 to vector<8x32xf32>
    %548 = arith.addf %547, %546 : vector<8x32xf32>
    %549 = arith.divf %547, %548 : vector<8x32xf32>
    %550 = arith.mulf %541, %520 : vector<8x32xf32>
    %551 = arith.mulf %535, %543 : vector<8x32xf32>
    %552 = arith.addf %550, %551 : vector<8x32xf32>
    %553 = math.tanh %552 : vector<8x32xf32>
    %554 = arith.mulf %549, %553 : vector<8x32xf32>
    %c8_i32_135 = arith.constant 8 : i32
    %555 = arith.truncf %554 : vector<8x32xf32> to vector<8x32xbf16>
    %c0_136 = arith.constant 0 : index
    %c0_137 = arith.constant 0 : index
    %556 = vector.load %arg8[%c0_136, %c0_137] : memref<32x128xbf16, #tpu.memory_space<vmem>>, vector<32x128xbf16>
    %cst_138 = arith.constant dense<0.000000e+00> : vector<8x128xf32>
    %557 = tpu.matmul %555, %556, %cst_138 {dimension_numbers = #tpu.dot_dimension_numbers<[1], [0], [0], [1], [0, 0, 1, 1], [], []>} : vector<8x32xbf16>, vector<32x128xbf16>, vector<8x128xf32> -> vector<8x128xf32>
    %c0_139 = arith.constant 0 : index
    %c0_140 = arith.constant 0 : index
    %558 = vector.load %arg9[%c0_139, %c0_140] : memref<1x128xf32, #tpu.memory_space<vmem>>, vector<1x128xf32>
    %559 = vector.broadcast %558 : vector<1x128xf32> to vector<8x128xf32>
    %560 = arith.addf %557, %559 : vector<8x128xf32>
    %cst_141 = arith.constant 0.000000e+00 : f32
    %561 = vector.broadcast %cst_141 : f32 to vector<8x128xf32>
    %562 = arith.maximumf %560, %561 : vector<8x128xf32>
    %c0_142 = arith.constant 0 : index
    %c0_143 = arith.constant 0 : index
    %563 = vector.load %arg10[%c0_142, %c0_143] : memref<8x128xf32, #tpu.memory_space<vmem>>, vector<8x128xf32>
    tpu.vector_store %arg10[%c0_142, %c0_143], %562 {strides = array<i32>} : memref<8x128xf32, #tpu.memory_space<vmem>>, vector<8x128xf32>,
    return
  }
  func.func @transform_0(%arg0: i32) -> (i32, i32, i32) {
    %c0_i32 = arith.constant 0 : i32
    %c0_i32_0 = arith.constant 0 : i32
    %c0_i32_1 = arith.constant 0 : i32
    return %arg0, %c0_i32, %c0_i32_0 : i32, i32, i32
  }
  func.func @transform_1(%arg0: i32) -> (i32, i32) {
    %c0_i32 = arith.constant 0 : i32
    %c0_i32_0 = arith.constant 0 : i32
    %c0_i32_1 = arith.constant 0 : i32
    return %c0_i32, %c0_i32_0 : i32, i32
  }
  func.func @transform_2(%arg0: i32) -> (i32, i32) {
    %c0_i32 = arith.constant 0 : i32
    %c0_i32_0 = arith.constant 0 : i32
    %c0_i32_1 = arith.constant 0 : i32
    return %c0_i32, %c0_i32_0 : i32, i32
  }
  func.func @transform_3(%arg0: i32) -> (i32, i32) {
    %c0_i32 = arith.constant 0 : i32
    %c0_i32_0 = arith.constant 0 : i32
    %c0_i32_1 = arith.constant 0 : i32
    return %c0_i32, %c0_i32_0 : i32, i32
  }
  func.func @transform_4(%arg0: i32) -> (i32, i32) {
    %c0_i32 = arith.constant 0 : i32
    %c0_i32_0 = arith.constant 0 : i32
    %c0_i32_1 = arith.constant 0 : i32
    return %c0_i32, %c0_i32_0 : i32, i32
  }
  func.func @transform_5(%arg0: i32) -> (i32, i32) {
    %c0_i32 = arith.constant 0 : i32
    %c0_i32_0 = arith.constant 0 : i32
    %c0_i32_1 = arith.constant 0 : i32
    return %c0_i32, %c0_i32_0 : i32, i32
  }
  func.func @transform_6(%arg0: i32) -> (i32, i32) {
    %c0_i32 = arith.constant 0 : i32
    %c0_i32_0 = arith.constant 0 : i32
    %c0_i32_1 = arith.constant 0 : i32
    return %c0_i32, %c0_i32_0 : i32, i32
  }
  func.func @transform_7(%arg0: i32) -> (i32, i32) {
    %c0_i32 = arith.constant 0 : i32
    %c0_i32_0 = arith.constant 0 : i32
    %c0_i32_1 = arith.constant 0 : i32
    return %c0_i32, %c0_i32_0 : i32, i32
  }
  func.func @transform_8(%arg0: i32) -> (i32, i32) {
    %c0_i32 = arith.constant 0 : i32
    %c0_i32_0 = arith.constant 0 : i32
    %c0_i32_1 = arith.constant 0 : i32
    return %c0_i32, %c0_i32_0 : i32, i32
  }
  func.func @transform_9(%arg0: i32) -> (i32, i32) {
    %c0_i32 = arith.constant 0 : i32
    %c0_i32_0 = arith.constant 0 : i32
    return %arg0, %c0_i32 : i32, i32
  }
}

</mosaic_0001>

<bundles_post_ra>
// kernel: vanilla_lstm_forward.1
= control target key start
LH: loop header
LB: loop body
LE: loop exit
PB: predicated region body
PF: predicated region fallthrough
CT: control target
= control target key end

     0   :  { %14 = vsyncpa [#allocation6], 0  ;;  %s3936_s0 = inlined_call_operand.vmem [shape: bf16[1,64,16], index: 0, kind: input, shape index: {}]   ;;  %s3937_s1 = inlined_call_operand.vmem [shape: bf16[16,512], index: 1, kind: input, shape index: {}]   ;;  %s3938_s2 = inlined_call_operand.vmem [shape: bf16[32,512], index: 2, kind: input, shape index: {}]   ;;  %s3939_s3 = inlined_call_operand.vmem [shape: f32[1,512], index: 3, kind: input, shape index: {}]   ;;  %s3940_s4 = inlined_call_operand.vmem [shape: bf16[32,512], index: 4, kind: input, shape index: {}]   ;;  %s3941_s5 = inlined_call_operand.hbm [shape: bf16[32,512], index: 5, kind: input, shape index: {}]   ;;  %s3942_s6 = inlined_call_operand.vmem [shape: f32[1,512], index: 6, kind: input, shape index: {}]   ;;  %s3943_s7 = inlined_call_operand.hbm [shape: bf16[32,128], index: 7, kind: input, shape index: {}]   ;;  %s3944_s8 = inlined_call_operand.vmem [shape: f32[1,128], index: 8, kind: input, shape index: {}]   ;;  %s3945_s9 = inlined_call_operand.hbm [shape: f32[8,128], index: 9, kind: output, shape index: {}]  }
   0x1   :  { %15 = vsyncpa [#allocation9], 0 }
   0x2   :  { %16 = vsyncpa [#allocation7], 0  ;;  %s3255_s30 = smov [#allocation5]  }
   0x3   :  { %s32_s10 = sshll.u32 %s3255_s30, 4  ;;  %s33_s10 = int_to_ptr.vmem [resolvable:$true] %s32_s10 }
   0x4   :  { %s3197_s11 = scalar_lea.vmem %s33_s10, 1024  ;;  %p3202_p1 = scmp.lt.s32.totalorder %s33_s10, %s33_s10 }
   0x5   :  { %p3198_p0 = scmp.ne.s32.totalorder %s33_s10, %s3197_s11  ;;  %p3203_p2 = scmp.lt.s32.totalorder %s3197_s11, %s3197_s11 }
   0x7   :  { %p3204_p3 = por %p3203_p2, %p3202_p1 }
   0x9   :  { %p3205_p4 = pnand %p3204_p3, %p3198_p0 }
   0xb   :  { %3208 = shalt.err (!%p3205_p4)
}
   0xc   :  { %s3256_s12 = smov 256   ;;  %s3257_s13 = smov 16  }
   0xd   :  { %38 = dma.hbm_to_vmem [thread:$0]  %s3941_s5, 1024, %s33_s10, [#allocation6], %s3256_s12, %s3256_s12, %s3257_s13  }
   0xe   :  { %s3258_s16 = smov [#allocation8]  }
   0xf   :  { %s46_s17 = sshll.u32 %s3258_s16, 4  ;;  %s47_s17 = int_to_ptr.vmem [resolvable:$true] %s46_s17 }
  0x10   :  { %s3217_s18 = scalar_lea.vmem %s47_s17, 256  ;;  %p3222_p6 = scmp.lt.s32.totalorder %s47_s17, %s47_s17 }
  0x11   :  { %p3218_p5 = scmp.ne.s32.totalorder %s47_s17, %s3217_s18  ;;  %p3223_p7 = scmp.lt.s32.totalorder %s3217_s18, %s3217_s18 }
  0x13   :  { %p3224_p8 = por %p3223_p7, %p3222_p6 }
  0x15   :  { %p3225_p9 = pnand %p3224_p8, %p3218_p5 }
  0x17   :  { %3228 = shalt.err (!%p3225_p9)
}
  0x18   :  { %s3259_s19 = smov 64   ;;  %s3260_s20 = smov 4  }
  0x19   :  { %52 = dma.hbm_to_vmem [thread:$0]  %s3943_s7, 256, %s47_s17, [#allocation9], %s3259_s19, %s3259_s19, %s3260_s20  }
  0x1a   :  { %3249 = dma.done.wait [#allocation6], 1024  }
  0x1b   :  { %3250 = vsyncadd [#allocation6], 4294966272 }
  0x1c   :  { %3251 = dma.done.wait [#allocation9], 256  }
  0x1d   :  { %3252 = vsyncadd [#allocation9], 4294967040  ;;  %v3261_v0 = vmov 0   ;;  %v2881_v1 = vld [vmem:[%s3937_s1 + $0x4] ss:$16 sps:$4 sm:$0xff]   ;;  %vm136_vm0 = vcmask 130048   ;;  %v76_v17 = vlaneseq }
  0x1e   :  { %181 = vmatprep.mubr.bf16.mxu0 %v3261_v0  ;;  %254 = vmatprep.mubr.bf16.mxu1 %v3261_v0  ;;  %v2883_v2 = vld [vmem:[%s3937_s1 + $0xc] ss:$16 sps:$4 sm:$0xff]   ;;  %v2885_v3 = vld [vmem:[%s3937_s1] ss:$16 sps:$4 sm:$0xff]   ;;  %v2886_v4 = vld [vmem:[%s3937_s1 + $0x8] ss:$16 sps:$4 sm:$0xff]  }
  0x1f   :  { %163 = vmatprep.subr.bf16.mxu0 %v2881_v1  ;;  %236 = vmatprep.subr.bf16.mxu1 %v2883_v2  ;;  %v2887_v5 = vld [vmem:[%s3936_s0] sm:$0xff]   ;;  %v3368_v10 = vld [vmem:[%s3938_s2 + $0x2c] ss:$16 sps:$4 sm:$0xff]   ;;  %v3373_v11 = vld [vmem:[%s3938_s2 + $0x28] ss:$16 sps:$4 sm:$0xff]   ;;  %v3425_v18 = vshrl.u32 %v76_v17, 7 }
  0x20   :  { %164 = vmatpush1.bf16.msra.mxu0 %v2885_v3  ;;  %237 = vmatpush1.bf16.msra.mxu1 %v2886_v4  ;;  %v3341_v6 = vld [vmem:[%s3938_s2 + $0x24] ss:$16 sps:$4 sm:$0xff]   ;;  %v3346_v7 = vld [vmem:[%s3938_s2 + $0x20] ss:$16 sps:$4 sm:$0xff]   ;;  %v2891_v12 = vld [vmem:[%s3936_s0 + $0x8] sm:$0xff]   ;;  %vm375_vm1 = vcmask 261120  }
  0x21   :  { %391 = vmatprep.subr.bf16.mxu0 %v3341_v6  ;;  %v3354_v8 = vld [vmem:[%s3938_s2 + $0x4] ss:$16 sps:$4 sm:$0xff]   ;;  %v3361_v9 = vld [vmem:[%s3938_s2] ss:$16 sps:$4 sm:$0xff]   ;;  %432 = vmatprep.subr.bf16.mxu1 %v3368_v10  ;;  %v3382_v13 = vld [vmem:[%s3938_s2 + $0xc] ss:$16 sps:$4 sm:$0xff]  }
  0x22   :  { %v3389_v14 = vld [vmem:[%s3938_s2 + $0x8] ss:$16 sps:$4 sm:$0xff]   ;;  %v2892_v15 = vld [vmem:[%s3936_s0 + $0x10] sm:$0xff]   ;;  %v3946_v19 = vsub.s32 2, %v3425_v18  ;;  %v78_v20 = vsub.s32 0, %v3425_v18  ;;  %v90_v21 = vsub.s32 3, %v3425_v18 }
  0x23   :  { %2736 = vmatmul.mubr.msk.bf16.vlgmr.msra.gmra.mxu0 %vm136_vm0, %v2887_v5  ;;  %2740 = vmatmul.mubr.msk.bf16.vlgmr.msra.gmra.mxu1 %vm136_vm0, %v2887_v5  ;;  %v2899_v16 = vld [vmem:[%s3936_s0 + $0x18] sm:$0xff]   ;;  %v74_v22 = vld [vmem:[%s3939_s3] sm:$0xf]  ;;  %v82_v26 = vsub.s32 1, %v3425_v18  ;;  %vm497_vm2 = vcmask 257024   ;;  %vm3263_vm3 = vmmov 0  }
  0x24   :  { %392 = vmatpush1.bf16.msra.mxu0 %v3346_v7  ;;  %191 = vmatprep.mubr.bf16.mxu0 %v3261_v0  ;;  %v3439_v25 = vrot.slane %v74_v22, %v3946_v19  ;;  %v79_v29 = vrot.slane %v74_v22, %v78_v20  ;;  %v3450_v30 = vrot.slane %v74_v22, %v90_v21  ;;  %s3264_s23 = smov [#allocation10]  }
  0x25   :  { %264 = vmatprep.mubr.bf16.mxu1 %v3261_v0  ;;  %393 = vmatprep.subr.bf16.mxu0 %v3354_v8  ;;  %v83_v33 = vrot.slane %v74_v22, %v82_v26  ;;  %s2711_s24 = sshll.u32 %s3264_s23, 4  ;;  %s2712_s24 = int_to_ptr.vmem [resolvable:$true] %s2711_s24 }
  0x26   :  { %433 = vmatpush1.bf16.msra.mxu1 %v3373_v11  ;;  %s3229_s25 = scalar_lea.vmem %s2712_s24, 128  ;;  %p3234_p11 = scmp.lt.s32.totalorder %s2712_s24, %s2712_s24 }
  0x27   :  { %434 = vmatprep.subr.bf16.mxu1 %v3382_v13  ;;  %p3230_p10 = scmp.ne.s32.totalorder %s2712_s24, %s3229_s25  ;;  %p3235_p12 = scmp.lt.s32.totalorder %s3229_s25, %s3229_s25 }
  0x28   :  { %394 = vmatpush1.bf16.msra.mxu0 %v3361_v9 }
  0x29   :  { %514 = vmatprep.subr.bf16.mxu0 %v3341_v6  ;;  %p3236_p13 = por %p3235_p12, %p3234_p11 }
  0x2a   :  { %435 = vmatpush1.bf16.msra.mxu1 %v3389_v14 }
  0x2b   :  { %2737 = vmatmul.mubr.msk.bf16.gmra.mxu0 %vm136_vm0, %v2891_v12  ;;  %2741 = vmatmul.mubr.msk.bf16.gmra.mxu1 %vm136_vm0, %v2891_v12  ;;  %p3237_p0 = pnand %p3236_p13, %p3230_p10 }
  0x2c   :  { %201 = vmatprep.mubr.bf16.mxu0 %v3261_v0  ;;  %274 = vmatprep.mubr.bf16.mxu1 %v3261_v0 }
  0x2d   :  { %555 = vmatprep.subr.bf16.mxu1 %v3368_v10 }
  0x33   :  { %2738 = vmatmul.mubr.msk.bf16.gmra.mxu0 %vm136_vm0, %v2892_v15  ;;  %2742 = vmatmul.mubr.msk.bf16.gmra.mxu1 %vm136_vm0, %v2892_v15 }
  0x34   :  { %211 = vmatprep.mubr.bf16.mxu0 %v3261_v0  ;;  %284 = vmatprep.mubr.bf16.mxu1 %v3261_v0 }
  0x3b   :  { %2739 = vmatmul.mubr.msk.bf16.gmra.mxu0 %vm136_vm0, %v2899_v16  ;;  %2743 = vmatmul.mubr.msk.bf16.gmra.mxu1 %vm136_vm0, %v2899_v16 }
  0x3c   :  { %411 = vmatprep.mubr.bf16.mxu0 %v3261_v0  ;;  %452 = vmatprep.mubr.bf16.mxu1 %v3261_v0 }
  0x43   :  { %412 = vmatmul.mubr.bf16.vlgmr.msra.gmra.mxu0 %v3261_v0  ;;  %453 = vmatmul.mubr.bf16.vlgmr.msra.gmra.mxu1 %v3261_v0 }
  0x44   :  { %515 = vmatpush1.bf16.msra.mxu0 %v3346_v7  ;;  %556 = vmatpush1.bf16.msra.mxu1 %v3373_v11 }
  0x45   :  { %516 = vmatprep.subr.bf16.mxu0 %v3354_v8  ;;  %557 = vmatprep.subr.bf16.mxu1 %v3382_v13 }
  0x46   :  { %534 = vmatprep.mubr.bf16.mxu0 %v3261_v0  ;;  %575 = vmatprep.mubr.bf16.mxu1 %v3261_v0 }
  0x48   :  { %517 = vmatpush1.bf16.msra.mxu0 %v3361_v9  ;;  %558 = vmatpush1.bf16.msra.mxu1 %v3389_v14 }
  0x49   :  { %637 = vmatprep.subr.bf16.mxu0 %v3341_v6  ;;  %678 = vmatprep.subr.bf16.mxu1 %v3368_v10 }
  0xe3   :  { %v3433_v23 = vpop.f32.mrf.mxu0  ;;  %v3435_v24 = vpop.f32.mrf.mxu1 }
  0xe5   :  { %v3442_v27 = vpop.f32.mrf.mxu0  ;;  %v3444_v28 = vpop.f32.mrf.mxu1 }
  0xe7   :  { %v187_v31 = vpop.f32.mrf.mxu0  ;;  %v260_v32 = vpop.f32.mrf.mxu1 }
  0xe8   :  { %v3454_v34 = vadd.f32 %v187_v31, %v79_v29  ;;  %v3457_v35 = vadd.f32 %v260_v32, %v3439_v25 }
  0xe9   :  { %v189_v36 = vpop.f32.mrf.mxu0  ;;  %v262_v37 = vpop.f32.mrf.mxu1 }
  0xea   :  { %v3459_v38 = vadd.f32 %v189_v36, %v83_v33  ;;  %v3462_v39 = vadd.f32 %v262_v37, %v3450_v30 }
  0xeb   :  { %v193_v40 = vpop.f32.mrf.mxu0  ;;  %v266_v41 = vpop.f32.mrf.mxu1 }
  0xec   :  { %v3464_v42 = vadd.f32 %v193_v40, %v79_v29  ;;  %v3467_v43 = vadd.f32 %v266_v41, %v3439_v25 }
  0xed   :  { %v195_v44 = vpop.f32.mrf.mxu0  ;;  %v268_v45 = vpop.f32.mrf.mxu1 }
  0xee   :  { %v3469_v46 = vadd.f32 %v195_v44, %v83_v33  ;;  %v3472_v47 = vadd.f32 %v268_v45, %v3450_v30 }
  0xef   :  { %v197_v48 = vpop.f32.mrf.mxu0  ;;  %v270_v49 = vpop.f32.mrf.mxu1 }
  0xf0   :  { %v3474_v50 = vadd.f32 %v197_v48, %v79_v29  ;;  %v3477_v51 = vadd.f32 %v270_v49, %v3439_v25 }
  0xf1   :  { %v199_v52 = vpop.f32.mrf.mxu0  ;;  %v272_v53 = vpop.f32.mrf.mxu1 }
  0xf2   :  { %v3479_v54 = vadd.f32 %v199_v52, %v83_v33  ;;  %v3482_v55 = vadd.f32 %v272_v53, %v3450_v30 }
  0xf3   :  { %v203_v56 = vpop.f32.mrf.mxu0  ;;  %v276_v57 = vpop.f32.mrf.mxu1 }
  0xf4   :  { %v3484_v58 = vadd.f32 %v203_v56, %v79_v29  ;;  %v3487_v59 = vadd.f32 %v276_v57, %v3439_v25  ;;  %v184_v56 = vadd.f32 %v3433_v23, %v79_v29 }
  0xf5   :  { %v205_v60 = vpop.f32.mrf.mxu0  ;;  %v278_v61 = vpop.f32.mrf.mxu1 }
  0xf6   :  { %v3489_v62 = vadd.f32 %v205_v60, %v83_v33  ;;  %v3492_v63 = vadd.f32 %v278_v61, %v3450_v30 }
  0xf7   :  { %v207_v1 = vpop.f32.mrf.mxu0  ;;  %v280_v2 = vpop.f32.mrf.mxu1 }
  0xf8   :  { %v3494_v3 = vadd.f32 %v207_v1, %v79_v29  ;;  %v3497_v4 = vadd.f32 %v280_v2, %v3439_v25  ;;  %v186_v2 = vadd.f32 %v3442_v27, %v83_v33 }
  0xf9   :  { %v209_v5 = vpop.f32.mrf.mxu0  ;;  %v282_v12 = vpop.f32.mrf.mxu1 }
  0xfa   :  { %v3499_v15 = vadd.f32 %v209_v5, %v83_v33  ;;  %v3502_v16 = vadd.f32 %v282_v12, %v3450_v30 }
  0xfb   :  { %v213_v17 = vpop.f32.mrf.mxu0  ;;  %v286_v22 = vpop.f32.mrf.mxu1 }
  0xfc   :  { %v3504_v31 = vadd.f32 %v213_v17, %v79_v29  ;;  %v3507_v32 = vadd.f32 %v286_v22, %v3439_v25 }
  0xfd   :  { %v215_v36 = vpop.f32.mrf.mxu0  ;;  %v288_v37 = vpop.f32.mrf.mxu1 }
  0xfe   :  { %v3509_v40 = vadd.f32 %v215_v36, %v83_v33  ;;  %v3512_v41 = vadd.f32 %v288_v37, %v3450_v30 }
  0xff   :  { %v217_v44 = vpop.f32.mrf.mxu0  ;;  %v290_v45 = vpop.f32.mrf.mxu1 }
 0x100   :  { %v3514_v48 = vadd.f32 %v217_v44, %v79_v29  ;;  %v3517_v49 = vadd.f32 %v290_v45, %v3439_v25  ;;  %v259_v29 = vadd.f32 %v3444_v28, %v3450_v30 }
 0x101   :  { %v219_v52 = vpop.f32.mrf.mxu0  ;;  %v292_v53 = vpop.f32.mrf.mxu1 }
 0x102   :  { %v3520_v57 = vadd.f32 %v219_v52, %v83_v33  ;;  %v3523_v60 = vadd.f32 %v292_v53, %v3450_v30  ;;  %v257_v53 = vadd.f32 %v3435_v24, %v3439_v25 }
 0x103   :  { %v413_v61 = vpop.f32.mrf.mxu0  ;;  %v454_v1 = vpop.f32.mrf.mxu1 }
 0x104   :  { %v468_v5 = vadd.f32 %v413_v61, %v184_v56  ;;  %v470_v56 = vadd.f32 %v454_v1, %v257_v53 }
 0x105   :  { %v415_v12 = vpop.f32.mrf.mxu0  ;;  %v456_v17 = vpop.f32.mrf.mxu1 }
 0x106   :  { %v2752_v22 = vmul.f32 -1.442695, %v468_v5  ;;  %v469_v36 = vadd.f32 %v415_v12, %v186_v2  ;;  %v471_v52 = vadd.f32 %v456_v17, %v259_v29 }
 0x107   :  { %v417_v37 = vpop.f32.mrf.mxu0  ;;  %v458_v44 = vpop.f32.mrf.mxu1 }
 0x108   :  { %2933 = vpow2.f32 %v2752_v22  ;;  %v2753_v45 = vmul.f32 -1.442695, %v469_v36  ;;  %v2754_v27 = vmul.f32 -1.442695, %v471_v52 }
 0x109   :  { %v418_v19 = vpop.f32.mrf.mxu0  ;;  %v459_v23 = vpop.f32.mrf.mxu1 }
 0x10a   :  { %2935 = vpow2.f32 %v2753_v45 }
 0x10b   :  { %2937 = vpow2.f32 %v2754_v27 }
 0x115   :  { %v2934_v33 = vpop.eup %2933 }
 0x116   :  { %v475_v61 = vadd.f32 1.0, %v2934_v33 }
 0x117   :  { %v2936_v5 = vpop.eup %2935 }
 0x118   :  { %2939 = vrcp.f32 %v475_v61  ;;  %v481_v2 = vadd.f32 1.0, %v2936_v5  ;;  %v2938_v19 = vpop.eup %2937 }
 0x119   :  { %2941 = vtanh.f32 %v470_v56  ;;  %v488_v37 = vadd.f32 1.0, %v2938_v19 }
 0x11a   :  { %2943 = vrcp.f32 %v481_v2 }
 0x11b   :  { %2945 = vrcp.f32 %v488_v37 }
 0x125   :  { %v2940_v12 = vpop.eup %2939 }
 0x126   :  { %v2942_v22 = vpop.eup %2941 }
 0x127   :  { %v2944_v36 = vpop.eup %2943  ;;  %v492_v30 = vmul.f32 %v2942_v22, %v2940_v12 }
 0x128   :  { %v491_v28 = vmul.f32 0.0, %v2944_v36  ;;  %v2946_v24 = vpop.eup %2945 }
 0x12a   :  { %v493_v17 = vadd.f32 %v492_v30, %v491_v28 }
 0x12c   :  { %2947 = vtanh.f32 %v493_v17 }
 0x139   :  { %v2948_v25 = vpop.eup %2947 }
 0x13a   :  { %v495_v1 = vmul.f32 %v2948_v25, %v2946_v24 }
 0x13c   :  { %v496_v44 = vpack.c.bf16 %v495_v1, %v495_v1 }
 0x13e   :  { %498 = vst.msk [vmem:[#allocation3] sm:$0xf] %vm497_vm2, %v496_v44  ;;  %2755 = vmatmul.mubr.msk.bf16.vlgmr.msra.gmra.mxu0 %vm375_vm1, %v496_v44  ;;  %2756 = vmatmul.mubr.msk.bf16.vlgmr.msra.gmra.mxu1 %vm375_vm1, %v496_v44 }
 0x13f   :  { %638 = vmatpush1.bf16.msra.mxu0 %v3346_v7  ;;  %679 = vmatpush1.bf16.msra.mxu1 %v3373_v11 }
 0x140   :  { %639 = vmatprep.subr.bf16.mxu0 %v3354_v8  ;;  %680 = vmatprep.subr.bf16.mxu1 %v3382_v13 }
 0x141   :  { %657 = vmatprep.mubr.bf16.mxu0 %v3261_v0  ;;  %698 = vmatprep.mubr.bf16.mxu1 %v3261_v0 }
 0x143   :  { %640 = vmatpush1.bf16.msra.mxu0 %v3361_v9  ;;  %681 = vmatpush1.bf16.msra.mxu1 %v3389_v14 }
 0x144   :  { %760 = vmatprep.subr.bf16.mxu0 %v3341_v6  ;;  %801 = vmatprep.subr.bf16.mxu1 %v3368_v10 }
 0x1fe   :  { %v536_v45 = vpop.f32.mrf.mxu0  ;;  %v577_v23 = vpop.f32.mrf.mxu1 }
 0x1ff   :  { %v591_v29 = vadd.f32 %v536_v45, %v3454_v34  ;;  %v593_v22 = vadd.f32 %v577_v23, %v3457_v35 }
 0x200   :  { %v538_v52 = vpop.f32.mrf.mxu0  ;;  %v579_v53 = vpop.f32.mrf.mxu1 }
 0x201   :  { %v2757_v27 = vmul.f32 -1.442695, %v591_v29  ;;  %v592_v33 = vadd.f32 %v538_v52, %v3459_v38  ;;  %v594_v12 = vadd.f32 %v579_v53, %v3462_v39 }
 0x202   :  { %v540_v56 = vpop.f32.mrf.mxu0  ;;  %v581_v61 = vpop.f32.mrf.mxu1 }
 0x203   :  { %2949 = vpow2.f32 %v2757_v27  ;;  %v2758_v5 = vmul.f32 -1.442695, %v592_v33  ;;  %v2759_v36 = vmul.f32 -1.442695, %v594_v12 }
 0x204   :  { %v541_v2 = vpop.f32.mrf.mxu0  ;;  %v582_v19 = vpop.f32.mrf.mxu1 }
 0x205   :  { %2951 = vpow2.f32 %v2758_v5 }
 0x206   :  { %2953 = vtanh.f32 %v593_v22 }
 0x207   :  { %2955 = vpow2.f32 %v2759_v36 }
 0x210   :  { %v2950_v37 = vpop.eup %2949 }
 0x211   :  { %v598_v28 = vadd.f32 1.0, %v2950_v37 }
 0x212   :  { %v2952_v34 = vpop.eup %2951 }
 0x213   :  { %2957 = vrcp.f32 %v598_v28  ;;  %v604_v30 = vadd.f32 1.0, %v2952_v34  ;;  %v2954_v38 = vpop.eup %2953 }
 0x214   :  { %v2956_v24 = vpop.eup %2955 }
 0x215   :  { %2959 = vrcp.f32 %v604_v30  ;;  %v611_v45 = vadd.f32 1.0, %v2956_v24 }
 0x217   :  { %2961 = vrcp.f32 %v611_v45 }
 0x220   :  { %v2958_v25 = vpop.eup %2957 }
 0x221   :  { %v615_v1 = vmul.f32 %v2958_v25, %v2954_v38 }
 0x222   :  { %v2960_v44 = vpop.eup %2959 }
 0x223   :  { %v614_v29 = vmul.f32 %v2960_v44, %v493_v17 }
 0x224   :  { %v2962_v35 = vpop.eup %2961 }
 0x225   :  { %v616_v52 = vadd.f32 %v615_v1, %v614_v29 }
 0x227   :  { %2963 = vtanh.f32 %v616_v52 }
 0x234   :  { %v2964_v39 = vpop.eup %2963 }
 0x235   :  { %v618_v23 = vmul.f32 %v2964_v39, %v2962_v35 }
 0x237   :  { %v619_v53 = vpack.c.bf16 %v618_v23, %v618_v23 }
 0x239   :  { %621 = vst.msk [vmem:[#allocation3 + $0x4] sm:$0xf] %vm497_vm2, %v619_v53  ;;  %2760 = vmatmul.mubr.msk.bf16.vlgmr.msra.gmra.mxu0 %vm375_vm1, %v619_v53  ;;  %2761 = vmatmul.mubr.msk.bf16.vlgmr.msra.gmra.mxu1 %vm375_vm1, %v619_v53 }
 0x23a   :  { %761 = vmatpush1.bf16.msra.mxu0 %v3346_v7  ;;  %802 = vmatpush1.bf16.msra.mxu1 %v3373_v11 }
 0x23b   :  { %762 = vmatprep.subr.bf16.mxu0 %v3354_v8  ;;  %803 = vmatprep.subr.bf16.mxu1 %v3382_v13 }
 0x23c   :  { %780 = vmatprep.mubr.bf16.mxu0 %v3261_v0  ;;  %821 = vmatprep.mubr.bf16.mxu1 %v3261_v0 }
 0x23e   :  { %763 = vmatpush1.bf16.msra.mxu0 %v3361_v9  ;;  %804 = vmatpush1.bf16.msra.mxu1 %v3389_v14 }
 0x23f   :  { %883 = vmatprep.subr.bf16.mxu0 %v3341_v6  ;;  %924 = vmatprep.subr.bf16.mxu1 %v3368_v10 }
 0x2f9   :  { %v659_v17 = vpop.f32.mrf.mxu0  ;;  %v700_v27 = vpop.f32.mrf.mxu1 }
 0x2fa   :  { %v714_v33 = vadd.f32 %v659_v17, %v3464_v42  ;;  %v716_v34 = vadd.f32 %v700_v27, %v3467_v43 }
 0x2fb   :  { %v661_v56 = vpop.f32.mrf.mxu0  ;;  %v702_v61 = vpop.f32.mrf.mxu1 }
 0x2fc   :  { %v2762_v5 = vmul.f32 -1.442695, %v714_v33  ;;  %v715_v2 = vadd.f32 %v661_v56, %v3469_v46  ;;  %v717_v28 = vadd.f32 %v702_v61, %v3472_v47 }
 0x2fd   :  { %v663_v19 = vpop.f32.mrf.mxu0  ;;  %v704_v12 = vpop.f32.mrf.mxu1 }
 0x2fe   :  { %2965 = vpow2.f32 %v2762_v5  ;;  %v2763_v22 = vmul.f32 -1.442695, %v715_v2  ;;  %v2764_v30 = vmul.f32 -1.442695, %v717_v28 }
 0x2ff   :  { %v664_v36 = vpop.f32.mrf.mxu0  ;;  %v705_v37 = vpop.f32.mrf.mxu1 }
 0x300   :  { %2967 = vpow2.f32 %v2763_v22 }
 0x301   :  { %2969 = vtanh.f32 %v716_v34 }
 0x302   :  { %2971 = vpow2.f32 %v2764_v30 }
 0x30b   :  { %v2966_v38 = vpop.eup %2965 }
 0x30c   :  { %v721_v24 = vadd.f32 1.0, %v2966_v38 }
 0x30d   :  { %v2968_v42 = vpop.eup %2967 }
 0x30e   :  { %2973 = vrcp.f32 %v721_v24  ;;  %v727_v25 = vadd.f32 1.0, %v2968_v42  ;;  %v2970_v46 = vpop.eup %2969 }
 0x30f   :  { %v2972_v1 = vpop.eup %2971 }
 0x310   :  { %2975 = vrcp.f32 %v727_v25  ;;  %v734_v35 = vadd.f32 1.0, %v2972_v1 }
 0x312   :  { %2977 = vrcp.f32 %v734_v35 }
 0x31b   :  { %v2974_v44 = vpop.eup %2973 }
 0x31c   :  { %v738_v45 = vmul.f32 %v2974_v44, %v2970_v46 }
 0x31d   :  { %v2976_v29 = vpop.eup %2975 }
 0x31e   :  { %v737_v39 = vmul.f32 %v2976_v29, %v616_v52 }
 0x31f   :  { %v2978_v43 = vpop.eup %2977 }
 0x320   :  { %v739_v23 = vadd.f32 %v738_v45, %v737_v39 }
 0x322   :  { %2979 = vtanh.f32 %v739_v23 }
 0x32f   :  { %v2980_v47 = vpop.eup %2979 }
 0x330   :  { %v741_v53 = vmul.f32 %v2980_v47, %v2978_v43 }
 0x332   :  { %v742_v17 = vpack.c.bf16 %v741_v53, %v741_v53 }
 0x334   :  { %744 = vst.msk [vmem:[#allocation3 + $0x8] sm:$0xf] %vm497_vm2, %v742_v17  ;;  %2765 = vmatmul.mubr.msk.bf16.vlgmr.msra.gmra.mxu0 %vm375_vm1, %v742_v17  ;;  %2766 = vmatmul.mubr.msk.bf16.vlgmr.msra.gmra.mxu1 %vm375_vm1, %v742_v17 }
 0x335   :  { %884 = vmatpush1.bf16.msra.mxu0 %v3346_v7  ;;  %925 = vmatpush1.bf16.msra.mxu1 %v3373_v11 }
 0x336   :  { %885 = vmatprep.subr.bf16.mxu0 %v3354_v8  ;;  %926 = vmatprep.subr.bf16.mxu1 %v3382_v13 }
 0x337   :  { %903 = vmatprep.mubr.bf16.mxu0 %v3261_v0  ;;  %944 = vmatprep.mubr.bf16.mxu1 %v3261_v0 }
 0x339   :  { %886 = vmatpush1.bf16.msra.mxu0 %v3361_v9  ;;  %927 = vmatpush1.bf16.msra.mxu1 %v3389_v14 }
 0x33a   :  { %1006 = vmatprep.subr.bf16.mxu0 %v3341_v6  ;;  %1047 = vmatprep.subr.bf16.mxu1 %v3368_v10 }
 0x3f4   :  { %v782_v52 = vpop.f32.mrf.mxu0  ;;  %v823_v27 = vpop.f32.mrf.mxu1 }
 0x3f5   :  { %v837_v33 = vadd.f32 %v782_v52, %v3474_v50  ;;  %v839_v34 = vadd.f32 %v823_v27, %v3477_v51 }
 0x3f6   :  { %v784_v56 = vpop.f32.mrf.mxu0  ;;  %v825_v61 = vpop.f32.mrf.mxu1 }
 0x3f7   :  { %v2767_v5 = vmul.f32 -1.442695, %v837_v33  ;;  %v838_v2 = vadd.f32 %v784_v56, %v3479_v54  ;;  %v840_v28 = vadd.f32 %v825_v61, %v3482_v55 }
 0x3f8   :  { %v786_v19 = vpop.f32.mrf.mxu0  ;;  %v827_v12 = vpop.f32.mrf.mxu1 }
 0x3f9   :  { %2981 = vpow2.f32 %v2767_v5  ;;  %v2768_v22 = vmul.f32 -1.442695, %v838_v2  ;;  %v2769_v30 = vmul.f32 -1.442695, %v840_v28 }
 0x3fa   :  { %v787_v36 = vpop.f32.mrf.mxu0  ;;  %v828_v37 = vpop.f32.mrf.mxu1 }
 0x3fb   :  { %2983 = vpow2.f32 %v2768_v22 }
 0x3fc   :  { %2985 = vtanh.f32 %v839_v34 }
 0x3fd   :  { %2987 = vpow2.f32 %v2769_v30 }
 0x406   :  { %v2982_v38 = vpop.eup %2981 }
 0x407   :  { %v844_v24 = vadd.f32 1.0, %v2982_v38 }
 0x408   :  { %v2984_v50 = vpop.eup %2983 }
 0x409   :  { %2989 = vrcp.f32 %v844_v24  ;;  %v850_v42 = vadd.f32 1.0, %v2984_v50  ;;  %v2986_v54 = vpop.eup %2985 }
 0x40a   :  { %v2988_v25 = vpop.eup %2987 }
 0x40b   :  { %2991 = vrcp.f32 %v850_v42  ;;  %v857_v45 = vadd.f32 1.0, %v2988_v25 }
 0x40d   :  { %2993 = vrcp.f32 %v857_v45 }
 0x416   :  { %v2990_v46 = vpop.eup %2989 }
 0x417   :  { %v861_v1 = vmul.f32 %v2990_v46, %v2986_v54 }
 0x418   :  { %v2992_v44 = vpop.eup %2991 }
 0x419   :  { %v860_v29 = vmul.f32 %v2992_v44, %v739_v23 }
 0x41a   :  { %v2994_v51 = vpop.eup %2993 }
 0x41b   :  { %v862_v35 = vadd.f32 %v861_v1, %v860_v29 }
 0x41d   :  { %2995 = vtanh.f32 %v862_v35 }
 0x42a   :  { %v2996_v55 = vpop.eup %2995 }
 0x42b   :  { %v864_v39 = vmul.f32 %v2996_v55, %v2994_v51 }
 0x42d   :  { %v865_v43 = vpack.c.bf16 %v864_v39, %v864_v39 }
 0x42f   :  { %867 = vst.msk [vmem:[#allocation3 + $0xc] sm:$0xf] %vm497_vm2, %v865_v43  ;;  %2770 = vmatmul.mubr.msk.bf16.vlgmr.msra.gmra.mxu0 %vm375_vm1, %v865_v43  ;;  %2771 = vmatmul.mubr.msk.bf16.vlgmr.msra.gmra.mxu1 %vm375_vm1, %v865_v43 }
 0x430   :  { %1007 = vmatpush1.bf16.msra.mxu0 %v3346_v7  ;;  %1048 = vmatpush1.bf16.msra.mxu1 %v3373_v11 }
 0x431   :  { %1008 = vmatprep.subr.bf16.mxu0 %v3354_v8  ;;  %1049 = vmatprep.subr.bf16.mxu1 %v3382_v13 }
 0x432   :  { %1026 = vmatprep.mubr.bf16.mxu0 %v3261_v0  ;;  %1067 = vmatprep.mubr.bf16.mxu1 %v3261_v0 }
 0x434   :  { %1009 = vmatpush1.bf16.msra.mxu0 %v3361_v9  ;;  %1050 = vmatpush1.bf16.msra.mxu1 %v3389_v14 }
 0x435   :  { %1129 = vmatprep.subr.bf16.mxu0 %v3341_v6  ;;  %1170 = vmatprep.subr.bf16.mxu1 %v3368_v10 }
 0x4ef   :  { %v905_v23 = vpop.f32.mrf.mxu0  ;;  %v946_v47 = vpop.f32.mrf.mxu1 }
 0x4f0   :  { %v960_v53 = vadd.f32 %v905_v23, %v3484_v58  ;;  %v962_v22 = vadd.f32 %v946_v47, %v3487_v59 }
 0x4f1   :  { %v907_v17 = vpop.f32.mrf.mxu0  ;;  %v948_v52 = vpop.f32.mrf.mxu1 }
 0x4f2   :  { %v2772_v27 = vmul.f32 -1.442695, %v960_v53  ;;  %v961_v33 = vadd.f32 %v907_v17, %v3489_v62  ;;  %v963_v12 = vadd.f32 %v948_v52, %v3492_v63 }
 0x4f3   :  { %v909_v56 = vpop.f32.mrf.mxu0  ;;  %v950_v61 = vpop.f32.mrf.mxu1 }
 0x4f4   :  { %2997 = vpow2.f32 %v2772_v27  ;;  %v2773_v5 = vmul.f32 -1.442695, %v961_v33  ;;  %v2774_v36 = vmul.f32 -1.442695, %v963_v12 }
 0x4f5   :  { %v910_v2 = vpop.f32.mrf.mxu0  ;;  %v951_v19 = vpop.f32.mrf.mxu1 }
 0x4f6   :  { %2999 = vpow2.f32 %v2773_v5 }
 0x4f7   :  { %3001 = vtanh.f32 %v962_v22 }
 0x4f8   :  { %3003 = vpow2.f32 %v2774_v36 }
 0x501   :  { %v2998_v37 = vpop.eup %2997 }
 0x502   :  { %v967_v28 = vadd.f32 1.0, %v2998_v37 }
 0x503   :  { %v3000_v58 = vpop.eup %2999 }
 0x504   :  { %3005 = vrcp.f32 %v967_v28  ;;  %v973_v34 = vadd.f32 1.0, %v3000_v58  ;;  %v3002_v62 = vpop.eup %3001  ;;  %v2905_v58 = vld [vmem:[%s3940_s4 + $0x24] ss:$16 sps:$4 sm:$0xff]  }
 0x505   :  { %v3004_v30 = vpop.eup %3003 }
 0x506   :  { %3007 = vrcp.f32 %v973_v34  ;;  %v980_v42 = vadd.f32 1.0, %v3004_v30 }
 0x508   :  { %3009 = vrcp.f32 %v980_v42 }
 0x511   :  { %v3006_v38 = vpop.eup %3005 }
 0x512   :  { %v984_v24 = vmul.f32 %v3006_v38, %v3002_v62 }
 0x513   :  { %v3008_v50 = vpop.eup %3007 }
 0x514   :  { %v983_v54 = vmul.f32 %v3008_v50, %v862_v35 }
 0x515   :  { %v3010_v59 = vpop.eup %3009 }
 0x516   :  { %v985_v25 = vadd.f32 %v984_v24, %v983_v54 }
 0x518   :  { %3011 = vtanh.f32 %v985_v25 }
 0x525   :  { %v3012_v63 = vpop.eup %3011 }
 0x526   :  { %v987_v46 = vmul.f32 %v3012_v63, %v3010_v59 }
 0x528   :  { %v988_v1 = vpack.c.bf16 %v987_v46, %v987_v46 }
 0x52a   :  { %990 = vst.msk [vmem:[#allocation3 + $0x10] sm:$0xf] %vm497_vm2, %v988_v1  ;;  %2775 = vmatmul.mubr.msk.bf16.vlgmr.msra.gmra.mxu0 %vm375_vm1, %v988_v1  ;;  %2776 = vmatmul.mubr.msk.bf16.vlgmr.msra.gmra.mxu1 %vm375_vm1, %v988_v1 }
 0x52b   :  { %1130 = vmatpush1.bf16.msra.mxu0 %v3346_v7  ;;  %1171 = vmatpush1.bf16.msra.mxu1 %v3373_v11 }
 0x52c   :  { %1131 = vmatprep.subr.bf16.mxu0 %v3354_v8  ;;  %1172 = vmatprep.subr.bf16.mxu1 %v3382_v13 }
 0x52d   :  { %1149 = vmatprep.mubr.bf16.mxu0 %v3261_v0  ;;  %1190 = vmatprep.mubr.bf16.mxu1 %v3261_v0 }
 0x52f   :  { %1132 = vmatpush1.bf16.msra.mxu0 %v3361_v9  ;;  %1173 = vmatpush1.bf16.msra.mxu1 %v3389_v14 }
 0x530   :  { %1252 = vmatprep.subr.bf16.mxu0 %v3341_v6  ;;  %1293 = vmatprep.subr.bf16.mxu1 %v3368_v10 }
 0x5ea   :  { %v1028_v44 = vpop.f32.mrf.mxu0  ;;  %v1069_v45 = vpop.f32.mrf.mxu1 }
 0x5eb   :  { %v1083_v29 = vadd.f32 %v1028_v44, %v3494_v3  ;;  %v1085_v10 = vadd.f32 %v1069_v45, %v3497_v4 }
 0x5ec   :  { %v1030_v35 = vpop.f32.mrf.mxu0  ;;  %v1071_v51 = vpop.f32.mrf.mxu1 }
 0x5ed   :  { %v2777_v55 = vmul.f32 -1.442695, %v1083_v29  ;;  %v1084_v39 = vadd.f32 %v1030_v35, %v3499_v15  ;;  %v1086_v6 = vadd.f32 %v1071_v51, %v3502_v16 }
 0x5ee   :  { %v1032_v43 = vpop.f32.mrf.mxu0  ;;  %v1073_v23 = vpop.f32.mrf.mxu1 }
 0x5ef   :  { %3013 = vpow2.f32 %v2777_v55  ;;  %v2778_v47 = vmul.f32 -1.442695, %v1084_v39  ;;  %v2779_v52 = vmul.f32 -1.442695, %v1086_v6  ;;  %v2903_v23 = vld [vmem:[%s3940_s4 + $0x20] ss:$16 sps:$4 sm:$0xff]  }
 0x5f0   :  { %v1033_v53 = vpop.f32.mrf.mxu0  ;;  %v1074_v17 = vpop.f32.mrf.mxu1  ;;  %v2914_v6 = vld [vmem:[%s3940_s4 + $0xc] ss:$16 sps:$4 sm:$0xff]  }
 0x5f1   :  { %3015 = vpow2.f32 %v2778_v47  ;;  %v2906_v47 = vld [vmem:[%s3940_s4 + $0x28] ss:$16 sps:$4 sm:$0xff]   ;;  %v2911_v17 = vld [vmem:[%s3940_s4 + $0x4] ss:$16 sps:$4 sm:$0xff]  }
 0x5f2   :  { %3017 = vtanh.f32 %v1085_v10  ;;  %v2909_v10 = vld [vmem:[%s3940_s4] ss:$16 sps:$4 sm:$0xff]  }
 0x5f3   :  { %3019 = vpow2.f32 %v2779_v52  ;;  %v2912_v52 = vld [vmem:[%s3940_s4 + $0x8] ss:$16 sps:$4 sm:$0xff]  }
 0x5fc   :  { %v3014_v27 = vpop.eup %3013 }
 0x5fd   :  { %v1090_v33 = vadd.f32 1.0, %v3014_v27  ;;  %v2915_v27 = vld [vmem:[#allocation3] sm:$0xff]  }
 0x5fe   :  { %v3016_v3 = vpop.eup %3015 }
 0x5ff   :  { %3021 = vrcp.f32 %v1090_v33  ;;  %v1096_v56 = vadd.f32 1.0, %v3016_v3  ;;  %v3018_v15 = vpop.eup %3017  ;;  %v2916_v33 = vld [vmem:[#allocation3 + $0x8] sm:$0xff]  }
 0x600   :  { %v3020_v61 = vpop.eup %3019 }
 0x601   :  { %3023 = vrcp.f32 %v1096_v56  ;;  %v1103_v12 = vadd.f32 1.0, %v3020_v61  ;;  %v3674_v56 = vld [vmem:[#allocation5 + $0x24] ss:$16 sps:$4 sm:$0xff]  }
 0x602   :  { %v3678_v61 = vld [vmem:[#allocation5 + $0x4] ss:$16 sps:$4 sm:$0xff]  }
 0x603   :  { %3025 = vrcp.f32 %v1103_v12  ;;  %v3693_v12 = vld [vmem:[#allocation5 + $0xc] ss:$16 sps:$4 sm:$0xff]  }
 0x60c   :  { %v3022_v5 = vpop.eup %3021 }
 0x60d   :  { %v1107_v2 = vmul.f32 %v3022_v5, %v3018_v15  ;;  %v3676_v15 = vld [vmem:[#allocation5 + $0x20] ss:$16 sps:$4 sm:$0xff]   ;;  %v3680_v5 = vld [vmem:[#allocation5 + $0x2c] ss:$16 sps:$4 sm:$0xff]  }
 0x60e   :  { %v3024_v19 = vpop.eup %3023 }
 0x60f   :  { %v1106_v22 = vmul.f32 %v3024_v19, %v985_v25  ;;  %v3686_v19 = vld [vmem:[#allocation5] ss:$16 sps:$4 sm:$0xff]  }
 0x610   :  { %v3026_v4 = vpop.eup %3025 }
 0x611   :  { %v1108_v36 = vadd.f32 %v1107_v2, %v1106_v22  ;;  %v3682_v2 = vld [vmem:[#allocation5 + $0x28] ss:$16 sps:$4 sm:$0xff]  }
 0x612   :  { %v3695_v22 = vld [vmem:[#allocation5 + $0x8] ss:$16 sps:$4 sm:$0xff]  }
 0x613   :  { %3027 = vtanh.f32 %v1108_v36 }
 0x620   :  { %v3028_v16 = vpop.eup %3027 }
 0x621   :  { %v1110_v37 = vmul.f32 %v3028_v16, %v3026_v4 }
 0x623   :  { %v1111_v28 = vpack.c.bf16 %v1110_v37, %v1110_v37 }
 0x625   :  { %1113 = vst.msk [vmem:[#allocation3 + $0x14] sm:$0xf] %vm497_vm2, %v1111_v28  ;;  %2780 = vmatmul.mubr.msk.bf16.vlgmr.msra.gmra.mxu0 %vm375_vm1, %v1111_v28  ;;  %2781 = vmatmul.mubr.msk.bf16.vlgmr.msra.gmra.mxu1 %vm375_vm1, %v1111_v28 }
 0x626   :  { %1253 = vmatpush1.bf16.msra.mxu0 %v3346_v7  ;;  %1294 = vmatpush1.bf16.msra.mxu1 %v3373_v11  ;;  %v2908_v7 = vld [vmem:[%s3940_s4 + $0x2c] ss:$16 sps:$4 sm:$0xff]  }
 0x627   :  { %1254 = vmatprep.subr.bf16.mxu0 %v3354_v8  ;;  %1295 = vmatprep.subr.bf16.mxu1 %v3382_v13 }
 0x628   :  { %1272 = vmatprep.mubr.bf16.mxu0 %v3261_v0  ;;  %1313 = vmatprep.mubr.bf16.mxu1 %v3261_v0 }
 0x62a   :  { %1255 = vmatpush1.bf16.msra.mxu0 %v3361_v9  ;;  %1296 = vmatpush1.bf16.msra.mxu1 %v3389_v14 }
 0x62b   :  { %1482 = vmatprep.subr.bf16.mxu0 %v2905_v58  ;;  %1555 = vmatprep.subr.bf16.mxu1 %v2908_v7 }
 0x62c   :  { %v2917_v3 = vld [vmem:[#allocation3 + $0x10] sm:$0xff]  }
 0x6e5   :  { %v1151_v8 = vpop.f32.mrf.mxu0  ;;  %v1192_v11 = vpop.f32.mrf.mxu1 }
 0x6e6   :  { %v1206_v13 = vadd.f32 %v1151_v8, %v3504_v31  ;;  %v1208_v25 = vadd.f32 %v1192_v11, %v3507_v32 }
 0x6e7   :  { %v1153_v34 = vpop.f32.mrf.mxu0  ;;  %v1194_v62 = vpop.f32.mrf.mxu1 }
 0x6e8   :  { %v2782_v30 = vmul.f32 -1.442695, %v1206_v13  ;;  %v1207_v9 = vadd.f32 %v1153_v34, %v3509_v40  ;;  %v1209_v54 = vadd.f32 %v1194_v62, %v3512_v41 }
 0x6e9   :  { %v1155_v14 = vpop.f32.mrf.mxu0  ;;  %v1196_v38 = vpop.f32.mrf.mxu1 }
 0x6ea   :  { %3029 = vpow2.f32 %v2782_v30  ;;  %v2783_v24 = vmul.f32 -1.442695, %v1207_v9  ;;  %v2784_v59 = vmul.f32 -1.442695, %v1209_v54 }
 0x6eb   :  { %v1156_v50 = vpop.f32.mrf.mxu0  ;;  %v1197_v42 = vpop.f32.mrf.mxu1 }
 0x6ec   :  { %3031 = vpow2.f32 %v2783_v24 }
 0x6ed   :  { %3033 = vtanh.f32 %v1208_v25 }
 0x6ee   :  { %3035 = vpow2.f32 %v2784_v59 }
 0x6f7   :  { %v3030_v63 = vpop.eup %3029 }
 0x6f8   :  { %v1213_v46 = vadd.f32 1.0, %v3030_v63 }
 0x6f9   :  { %v3032_v31 = vpop.eup %3031 }
 0x6fa   :  { %3037 = vrcp.f32 %v1213_v46  ;;  %v1219_v1 = vadd.f32 1.0, %v3032_v31  ;;  %v3034_v40 = vpop.eup %3033 }
 0x6fb   :  { %v3036_v44 = vpop.eup %3035 }
 0x6fc   :  { %3039 = vrcp.f32 %v1219_v1  ;;  %v1226_v51 = vadd.f32 1.0, %v3036_v44 }
 0x6fe   :  { %3041 = vrcp.f32 %v1226_v51 }
 0x707   :  { %v3038_v45 = vpop.eup %3037 }
 0x708   :  { %v1230_v29 = vmul.f32 %v3038_v45, %v3034_v40 }
 0x709   :  { %v3040_v35 = vpop.eup %3039 }
 0x70a   :  { %v1229_v55 = vmul.f32 %v3040_v35, %v1108_v36 }
 0x70b   :  { %v3042_v32 = vpop.eup %3041 }
 0x70c   :  { %v3636_v39 = vadd.f32 %v1230_v29, %v1229_v55 }
 0x70e   :  { %3043 = vtanh.f32 %v3636_v39 }
 0x71b   :  { %v3044_v41 = vpop.eup %3043 }
 0x71c   :  { %v1233_v43 = vmul.f32 %v3044_v41, %v3042_v32 }
 0x71e   :  { %v1234_v53 = vpack.c.bf16 %v1233_v43, %v1233_v43 }
 0x720   :  { %1236 = vst.msk [vmem:[#allocation3 + $0x18] sm:$0xf] %vm497_vm2, %v1234_v53  ;;  %2785 = vmatmul.mubr.msk.bf16.vlgmr.msra.gmra.mxu0 %vm375_vm1, %v1234_v53  ;;  %2786 = vmatmul.mubr.msk.bf16.vlgmr.msra.gmra.mxu1 %vm375_vm1, %v1234_v53 }
 0x721   :  { %1483 = vmatpush1.bf16.msra.mxu0 %v2903_v23  ;;  %1556 = vmatpush1.bf16.msra.mxu1 %v2906_v47 }
 0x722   :  { %1484 = vmatprep.subr.bf16.mxu0 %v2911_v17  ;;  %1557 = vmatprep.subr.bf16.mxu1 %v2914_v6 }
 0x723   :  { %1502 = vmatprep.mubr.bf16.mxu0 %v3261_v0  ;;  %1575 = vmatprep.mubr.bf16.mxu1 %v3261_v0 }
 0x725   :  { %1485 = vmatpush1.bf16.msra.mxu0 %v2909_v10  ;;  %1558 = vmatpush1.bf16.msra.mxu1 %v2912_v52 }
 0x726   :  { %1708 = vmatprep.subr.bf16.mxu0 %v3674_v56  ;;  %1749 = vmatprep.subr.bf16.mxu1 %v3680_v5 }
 0x728   :  { %2802 = vmatmul.mubr.msk.bf16.vlgmr.msra.gmra.mxu0 %vm375_vm1, %v2915_v27  ;;  %2806 = vmatmul.mubr.msk.bf16.vlgmr.msra.gmra.mxu1 %vm375_vm1, %v2915_v27 }
 0x729   :  { %1512 = vmatprep.mubr.bf16.mxu0 %v3261_v0  ;;  %1585 = vmatprep.mubr.bf16.mxu1 %v3261_v0 }
 0x72a   :  { %1709 = vmatpush1.bf16.msra.mxu0 %v3676_v15  ;;  %1750 = vmatpush1.bf16.msra.mxu1 %v3682_v2 }
 0x72b   :  { %1710 = vmatprep.subr.bf16.mxu0 %v3678_v61  ;;  %1751 = vmatprep.subr.bf16.mxu1 %v3693_v12 }
 0x72e   :  { %1711 = vmatpush1.bf16.msra.mxu0 %v3686_v19  ;;  %1752 = vmatpush1.bf16.msra.mxu1 %v3695_v22 }
 0x72f   :  { %1826 = vmatprep.subr.bf16.mxu0 %v3674_v56  ;;  %1867 = vmatprep.subr.bf16.mxu1 %v3680_v5 }
 0x730   :  { %2803 = vmatmul.mubr.msk.bf16.gmra.mxu0 %vm375_vm1, %v2916_v33  ;;  %2807 = vmatmul.mubr.msk.bf16.gmra.mxu1 %vm375_vm1, %v2916_v33 }
 0x731   :  { %1522 = vmatprep.mubr.bf16.mxu0 %v3261_v0  ;;  %1595 = vmatprep.mubr.bf16.mxu1 %v3261_v0 }
 0x738   :  { %2804 = vmatmul.mubr.msk.bf16.gmra.mxu0 %vm375_vm1, %v2917_v3  ;;  %2808 = vmatmul.mubr.msk.bf16.gmra.mxu1 %vm375_vm1, %v2917_v3 }
 0x739   :  { %1532 = vmatprep.mubr.bf16.mxu0 %v3261_v0  ;;  %1605 = vmatprep.mubr.bf16.mxu1 %v3261_v0 }
 0x7e0   :  { %v1274_v36 = vpop.f32.mrf.mxu0  ;;  %v1315_v4 = vpop.f32.mrf.mxu1 }
 0x7e1   :  { %v1329_v16 = vadd.f32 %v1274_v36, %v3514_v48  ;;  %v1331_v9 = vadd.f32 %v1315_v4, %v3517_v49 }
 0x7e2   :  { %v1276_v37 = vpop.f32.mrf.mxu0  ;;  %v1317_v28 = vpop.f32.mrf.mxu1 }
 0x7e3   :  { %v2787_v58 = vmul.f32 -1.442695, %v1329_v16  ;;  %v1330_v7 = vadd.f32 %v1276_v37, %v3520_v57  ;;  %v1332_v30 = vadd.f32 %v1317_v28, %v3523_v60 }
 0x7e4   :  { %v1278_v8 = vpop.f32.mrf.mxu0  ;;  %v1319_v11 = vpop.f32.mrf.mxu1 }
 0x7e5   :  { %3045 = vpow2.f32 %v2787_v58  ;;  %v2788_v13 = vmul.f32 -1.442695, %v1330_v7  ;;  %v2789_v14 = vmul.f32 -1.442695, %v1332_v30  ;;  %v1376_v58 = vld [vmem:[%s3942_s6] sm:$0xf] }
 0x7e6   :  { %v1279_v34 = vpop.f32.mrf.mxu0  ;;  %v1320_v62 = vpop.f32.mrf.mxu1 }
 0x7e7   :  { %3047 = vpow2.f32 %v2788_v13  ;;  %v3775_v34 = vrot.slane %v1376_v58, %v78_v20 }
 0x7e8   :  { %3049 = vtanh.f32 %v1331_v9  ;;  %v1504_v45 = vpop.f32.mrf.mxu0  ;;  %v1577_v29 = vpop.f32.mrf.mxu1  ;;  %v3783_v9 = vrot.slane %v1376_v58, %v82_v26 }
 0x7e9   :  { %3051 = vpow2.f32 %v2789_v14 }
 0x7ea   :  { %v1506_v35 = vpop.f32.mrf.mxu0  ;;  %v1579_v51 = vpop.f32.mrf.mxu1 }
 0x7ec   :  { %v3722_v55 = vpop.f32.mrf.mxu0 }
 0x7ee   :  { %v3726_v32 = vpop.f32.mrf.mxu0 }
 0x7f0   :  { %v3730_v43 = vpop.f32.mrf.mxu0 }
 0x7f2   :  { %v3046_v38 = vpop.eup %3045  ;;  %v3734_v47 = vpop.f32.mrf.mxu0 }
 0x7f3   :  { %v1336_v24 = vadd.f32 1.0, %v3046_v38 }
 0x7f4   :  { %v3048_v48 = vpop.eup %3047  ;;  %v3738_v17 = vpop.f32.mrf.mxu0 }
 0x7f5   :  { %3053 = vrcp.f32 %v1336_v24  ;;  %v1342_v50 = vadd.f32 1.0, %v3048_v48  ;;  %v3050_v57 = vpop.eup %3049  ;;  %v1505_v24 = vadd.f32 %v1504_v45, %v3775_v34 }
 0x7f6   :  { %v3052_v42 = vpop.eup %3051  ;;  %v3742_v10 = vpop.f32.mrf.mxu0 }
 0x7f7   :  { %3055 = vrcp.f32 %v1342_v50  ;;  %v1349_v63 = vadd.f32 1.0, %v3052_v42 }
 0x7f8   :  { %v3746_v27 = vpop.f32.mrf.mxu0 }
 0x7f9   :  { %3057 = vrcp.f32 %v1349_v63 }
 0x7fa   :  { %v3750_v3 = vpop.f32.mrf.mxu0 }
 0x7fc   :  { %v3754_v4 = vpop.f32.mrf.mxu0 }
 0x7fe   :  { %v3758_v37 = vpop.f32.mrf.mxu0 }
 0x802   :  { %v3054_v54 = vpop.eup %3053 }
 0x803   :  { %v1353_v25 = vmul.f32 %v3054_v54, %v3050_v57  ;;  %v1507_v57 = vadd.f32 %v1506_v35, %v3783_v9 }
 0x804   :  { %v3056_v59 = vpop.eup %3055 }
 0x805   :  { %v1352_v46 = vmul.f32 %v3056_v59, %v3636_v39  ;;  %v3724_v39 = vpop.f32.mrf.mxu1 }
 0x806   :  { %v3058_v49 = vpop.eup %3057 }
 0x807   :  { %v1354_v60 = vadd.f32 %v1353_v25, %v1352_v46  ;;  %v3728_v41 = vpop.f32.mrf.mxu1 }
 0x809   :  { %3059 = vtanh.f32 %v1354_v60  ;;  %v3732_v23 = vpop.f32.mrf.mxu1  ;;  %v3793_v60 = vrot.slane %v1376_v58, %v90_v21 }
 0x80b   :  { %v3736_v53 = vpop.f32.mrf.mxu1 }
 0x80d   :  { %v3740_v6 = vpop.f32.mrf.mxu1 }
 0x80f   :  { %v3744_v52 = vpop.f32.mrf.mxu1 }
 0x811   :  { %v3748_v33 = vpop.f32.mrf.mxu1 }
 0x813   :  { %v3752_v36 = vpop.f32.mrf.mxu1 }
 0x815   :  { %v3756_v16 = vpop.f32.mrf.mxu1 }
 0x816   :  { %v3060_v31 = vpop.eup %3059 }
 0x817   :  { %v1356_v1 = vmul.f32 %v3060_v31, %v3058_v49  ;;  %v3760_v28 = vpop.f32.mrf.mxu1 }
 0x819   :  { %v1357_v40 = vpack.c.bf16 %v1356_v1, %v1356_v1  ;;  %v1580_v1 = vadd.f32 %v1579_v51, %v3793_v60 }
 0x81b   :  { %1359 = vst.msk [vmem:[#allocation3 + $0x1c] sm:$0xf] %vm497_vm2, %v1357_v40  ;;  %v3947_v40 = vsub.s32 2, %v3425_v18 }
 0x822   :  { %v2927_v44 = vld [vmem:[#allocation3 + $0x18] sm:$0xff]  }
 0x823   :  { %2805 = vmatmul.mubr.msk.bf16.gmra.mxu0 %vm375_vm1, %v2927_v44  ;;  %2809 = vmatmul.mubr.msk.bf16.gmra.mxu1 %vm375_vm1, %v2927_v44  ;;  %v3798_v44 = vrot.slane %v1376_v58, %v3947_v40 }
 0x824   :  { %1728 = vmatprep.mubr.bf16.mxu0 %v3261_v0  ;;  %1769 = vmatprep.mubr.bf16.mxu1 %v3261_v0 }
 0x825   :  { %v1578_v35 = vadd.f32 %v1577_v29, %v3798_v44 }
 0x82b   :  { %1729 = vmatmul.mubr.bf16.vlgmr.msra.gmra.mxu0 %v3261_v0  ;;  %1770 = vmatmul.mubr.bf16.vlgmr.msra.gmra.mxu1 %v3261_v0 }
 0x82c   :  { %1827 = vmatpush1.bf16.msra.mxu0 %v3676_v15  ;;  %1868 = vmatpush1.bf16.msra.mxu1 %v3682_v2 }
 0x82d   :  { %1828 = vmatprep.subr.bf16.mxu0 %v3678_v61  ;;  %1869 = vmatprep.subr.bf16.mxu1 %v3693_v12 }
 0x82e   :  { %1846 = vmatprep.mubr.bf16.mxu0 %v3261_v0  ;;  %1887 = vmatprep.mubr.bf16.mxu1 %v3261_v0 }
 0x830   :  { %1829 = vmatpush1.bf16.msra.mxu0 %v3686_v19  ;;  %1870 = vmatpush1.bf16.msra.mxu1 %v3695_v22 }
 0x831   :  { %1944 = vmatprep.subr.bf16.mxu0 %v3674_v56  ;;  %1985 = vmatprep.subr.bf16.mxu1 %v3680_v5 }
 0x8e3   :  { %v3765_v7 = vpop.f32.mrf.mxu0  ;;  %v3767_v8 = vpop.f32.mrf.mxu1 }
 0x8e5   :  { %v3769_v11 = vpop.f32.mrf.mxu0  ;;  %v3771_v13 = vpop.f32.mrf.mxu1 }
 0x8e7   :  { %v3777_v62 = vpop.f32.mrf.mxu0  ;;  %v3779_v30 = vpop.f32.mrf.mxu1 }
 0x8e9   :  { %v3785_v14 = vpop.f32.mrf.mxu0  ;;  %v3787_v38 = vpop.f32.mrf.mxu1 }
 0x8eb   :  { %v1730_v48 = vpop.f32.mrf.mxu0  ;;  %v1771_v50 = vpop.f32.mrf.mxu1 }
 0x8ec   :  { %v1782_v20 = vadd.f32 %v1730_v48, %v1505_v24 }
 0x8ed   :  { %v1732_v42 = vpop.f32.mrf.mxu0  ;;  %v1773_v54 = vpop.f32.mrf.mxu1 }
 0x8ee   :  { %v2818_v25 = vmul.f32 -1.442695, %v1782_v20  ;;  %v1783_v59 = vadd.f32 %v1732_v42, %v1507_v57  ;;  %v1785_v45 = vadd.f32 %v1773_v54, %v1580_v1  ;;  %v1784_v57 = vadd.f32 %v1771_v50, %v1578_v35 }
 0x8ef   :  { %v1734_v63 = vpop.f32.mrf.mxu0  ;;  %v1775_v46 = vpop.f32.mrf.mxu1 }
 0x8f0   :  { %3061 = vpow2.f32 %v2818_v25  ;;  %v2819_v26 = vmul.f32 -1.442695, %v1783_v59  ;;  %v2820_v24 = vmul.f32 -1.442695, %v1785_v45  ;;  %v1511_v45 = vadd.f32 %v3726_v32, %v3783_v9 }
 0x8f1   :  { %v1735_v49 = vpop.f32.mrf.mxu0  ;;  %v1776_v31 = vpop.f32.mrf.mxu1 }
 0x8f2   :  { %3063 = vpow2.f32 %v2819_v26  ;;  %v1509_v31 = vadd.f32 %v3722_v55, %v3775_v34  ;;  %v1584_v55 = vadd.f32 %v3728_v41, %v3793_v60 }
 0x8f3   :  { %3065 = vpow2.f32 %v2820_v24 }
 0x8fd   :  { %v3062_v48 = vpop.eup %3061 }
 0x8fe   :  { %v1789_v20 = vadd.f32 1.0, %v3062_v48 }
 0x8ff   :  { %v3064_v42 = vpop.eup %3063 }
 0x900   :  { %3067 = vrcp.f32 %v1789_v20  ;;  %v1795_v21 = vadd.f32 1.0, %v3064_v42  ;;  %v3066_v25 = vpop.eup %3065 }
 0x901   :  { %3069 = vtanh.f32 %v1784_v57  ;;  %v1802_v18 = vadd.f32 1.0, %v3066_v25 }
 0x902   :  { %3071 = vrcp.f32 %v1795_v21 }
 0x903   :  { %3073 = vrcp.f32 %v1802_v18  ;;  %v1582_v18 = vadd.f32 %v3724_v39, %v3798_v44 }
 0x90d   :  { %v3068_v59 = vpop.eup %3067 }
 0x90e   :  { %v3070_v51 = vpop.eup %3069 }
 0x90f   :  { %v3072_v63 = vpop.eup %3071  ;;  %v1806_v46 = vmul.f32 %v3070_v51, %v3068_v59 }
 0x910   :  { %v1805_v58 = vmul.f32 0.0, %v3072_v63  ;;  %v3074_v29 = vpop.eup %3073 }
 0x912   :  { %v1807_v54 = vadd.f32 %v1806_v46, %v1805_v58 }
 0x914   :  { %3075 = vtanh.f32 %v1807_v54 }
 0x921   :  { %v3076_v26 = vpop.eup %3075 }
 0x922   :  { %v1809_v50 = vmul.f32 %v3076_v26, %v3074_v29 }
 0x924   :  { %v1810_v49 = vpack.c.bf16 %v1809_v50, %v1809_v50 }
 0x926   :  { %2821 = vmatmul.mubr.msk.bf16.vlgmr.msra.gmra.mxu0 %vm375_vm1, %v1810_v49  ;;  %2822 = vmatmul.mubr.msk.bf16.vlgmr.msra.gmra.mxu1 %vm375_vm1, %v1810_v49 }
 0x927   :  { %1945 = vmatpush1.bf16.msra.mxu0 %v3676_v15  ;;  %1986 = vmatpush1.bf16.msra.mxu1 %v3682_v2 }
 0x928   :  { %1946 = vmatprep.subr.bf16.mxu0 %v3678_v61  ;;  %1987 = vmatprep.subr.bf16.mxu1 %v3693_v12 }
 0x929   :  { %1964 = vmatprep.mubr.bf16.mxu0 %v3261_v0  ;;  %2005 = vmatprep.mubr.bf16.mxu1 %v3261_v0 }
 0x92b   :  { %1947 = vmatpush1.bf16.msra.mxu0 %v3686_v19  ;;  %1988 = vmatpush1.bf16.msra.mxu1 %v3695_v22 }
 0x92c   :  { %2062 = vmatprep.subr.bf16.mxu0 %v3674_v56  ;;  %2103 = vmatprep.subr.bf16.mxu1 %v3680_v5 }
 0x9e6   :  { %v1848_v1 = vpop.f32.mrf.mxu0  ;;  %v1889_v40 = vpop.f32.mrf.mxu1 }
 0x9e7   :  { %v1900_v35 = vadd.f32 %v1848_v1, %v1509_v31  ;;  %v1902_v32 = vadd.f32 %v1889_v40, %v1582_v18 }
 0x9e8   :  { %v1850_v24 = vpop.f32.mrf.mxu0  ;;  %v1891_v48 = vpop.f32.mrf.mxu1 }
 0x9e9   :  { %v2823_v57 = vmul.f32 -1.442695, %v1900_v35  ;;  %v1901_v20 = vadd.f32 %v1850_v24, %v1511_v45  ;;  %v1903_v63 = vadd.f32 %v1891_v48, %v1584_v55 }
 0x9ea   :  { %v1852_v42 = vpop.f32.mrf.mxu0  ;;  %v1893_v21 = vpop.f32.mrf.mxu1 }
 0x9eb   :  { %3077 = vpow2.f32 %v2823_v57  ;;  %v2824_v25 = vmul.f32 -1.442695, %v1901_v20  ;;  %v2825_v58 = vmul.f32 -1.442695, %v1903_v63 }
 0x9ec   :  { %v1853_v59 = vpop.f32.mrf.mxu0  ;;  %v1894_v51 = vpop.f32.mrf.mxu1 }
 0x9ed   :  { %3079 = vpow2.f32 %v2824_v25  ;;  %v1517_v25 = vadd.f32 %v3734_v47, %v3783_v9 }
 0x9ee   :  { %3081 = vtanh.f32 %v1902_v32 }
 0x9ef   :  { %3083 = vpow2.f32 %v2825_v58 }
 0x9f8   :  { %v3078_v46 = vpop.eup %3077 }
 0x9f9   :  { %v1907_v29 = vadd.f32 1.0, %v3078_v46 }
 0x9fa   :  { %v3080_v26 = vpop.eup %3079 }
 0x9fb   :  { %3085 = vrcp.f32 %v1907_v29  ;;  %v1913_v50 = vadd.f32 1.0, %v3080_v26  ;;  %v3082_v49 = vpop.eup %3081 }
 0x9fc   :  { %v3084_v31 = vpop.eup %3083 }
 0x9fd   :  { %3087 = vrcp.f32 %v1913_v50  ;;  %v1920_v41 = vadd.f32 1.0, %v3084_v31 }
 0x9ff   :  { %3089 = vrcp.f32 %v1920_v41 }
 0xa08   :  { %v3086_v1 = vpop.eup %3085 }
 0xa09   :  { %v1924_v45 = vmul.f32 %v3086_v1, %v3082_v49  ;;  %v1588_v49 = vadd.f32 %v3732_v23, %v3798_v44 }
 0xa0a   :  { %v3088_v35 = vpop.eup %3087 }
 0xa0b   :  { %v1923_v24 = vmul.f32 %v3088_v35, %v1807_v54  ;;  %v1515_v54 = vadd.f32 %v3730_v43, %v3775_v34  ;;  %v1590_v43 = vadd.f32 %v3736_v53, %v3793_v60 }
 0xa0c   :  { %v3090_v39 = vpop.eup %3089 }
 0xa0d   :  { %v1925_v48 = vadd.f32 %v1924_v45, %v1923_v24 }
 0xa0f   :  { %3091 = vtanh.f32 %v1925_v48 }
 0xa1c   :  { %v3092_v40 = vpop.eup %3091 }
 0xa1d   :  { %v1927_v57 = vmul.f32 %v3092_v40, %v3090_v39 }
 0xa1f   :  { %v1928_v20 = vpack.c.bf16 %v1927_v57, %v1927_v57 }
 0xa21   :  { %2826 = vmatmul.mubr.msk.bf16.vlgmr.msra.gmra.mxu0 %vm375_vm1, %v1928_v20  ;;  %2827 = vmatmul.mubr.msk.bf16.vlgmr.msra.gmra.mxu1 %vm375_vm1, %v1928_v20 }
 0xa22   :  { %2063 = vmatpush1.bf16.msra.mxu0 %v3676_v15  ;;  %2104 = vmatpush1.bf16.msra.mxu1 %v3682_v2 }
 0xa23   :  { %2064 = vmatprep.subr.bf16.mxu0 %v3678_v61  ;;  %2105 = vmatprep.subr.bf16.mxu1 %v3693_v12 }
 0xa24   :  { %2082 = vmatprep.mubr.bf16.mxu0 %v3261_v0  ;;  %2123 = vmatprep.mubr.bf16.mxu1 %v3261_v0 }
 0xa26   :  { %2065 = vmatpush1.bf16.msra.mxu0 %v3686_v19  ;;  %2106 = vmatpush1.bf16.msra.mxu1 %v3695_v22 }
 0xa27   :  { %2180 = vmatprep.subr.bf16.mxu0 %v3674_v56  ;;  %2221 = vmatprep.subr.bf16.mxu1 %v3680_v5 }
 0xae1   :  { %v1966_v42 = vpop.f32.mrf.mxu0  ;;  %v2007_v21 = vpop.f32.mrf.mxu1 }
 0xae2   :  { %v2018_v59 = vadd.f32 %v1966_v42, %v1515_v54  ;;  %v2020_v47 = vadd.f32 %v2007_v21, %v1588_v49 }
 0xae3   :  { %v1968_v51 = vpop.f32.mrf.mxu0  ;;  %v2009_v55 = vpop.f32.mrf.mxu1 }
 0xae4   :  { %v2828_v63 = vmul.f32 -1.442695, %v2018_v59  ;;  %v2019_v18 = vadd.f32 %v1968_v51, %v1517_v25  ;;  %v2021_v50 = vadd.f32 %v2009_v55, %v1590_v43 }
 0xae5   :  { %v1970_v32 = vpop.f32.mrf.mxu0  ;;  %v2011_v58 = vpop.f32.mrf.mxu1 }
 0xae6   :  { %3093 = vpow2.f32 %v2828_v63  ;;  %v2829_v46 = vmul.f32 -1.442695, %v2019_v18  ;;  %v2830_v31 = vmul.f32 -1.442695, %v2021_v50  ;;  %v1521_v63 = vadd.f32 %v3742_v10, %v3783_v9 }
 0xae7   :  { %v1971_v29 = vpop.f32.mrf.mxu0  ;;  %v2012_v26 = vpop.f32.mrf.mxu1 }
 0xae8   :  { %3095 = vpow2.f32 %v2829_v46 }
 0xae9   :  { %3097 = vtanh.f32 %v2020_v47 }
 0xaea   :  { %3099 = vpow2.f32 %v2830_v31 }
 0xaf3   :  { %v3094_v1 = vpop.eup %3093 }
 0xaf4   :  { %v2025_v45 = vadd.f32 1.0, %v3094_v1  ;;  %v1592_v1 = vadd.f32 %v3740_v6, %v3798_v44 }
 0xaf5   :  { %v3096_v35 = vpop.eup %3095 }
 0xaf6   :  { %3101 = vrcp.f32 %v2025_v45  ;;  %v2031_v41 = vadd.f32 1.0, %v3096_v35  ;;  %v3098_v24 = vpop.eup %3097 }
 0xaf7   :  { %v3100_v39 = vpop.eup %3099 }
 0xaf8   :  { %3103 = vrcp.f32 %v2031_v41  ;;  %v2038_v53 = vadd.f32 1.0, %v3100_v39 }
 0xafa   :  { %3105 = vrcp.f32 %v2038_v53 }
 0xb03   :  { %v3102_v40 = vpop.eup %3101 }
 0xb04   :  { %v2042_v57 = vmul.f32 %v3102_v40, %v3098_v24 }
 0xb05   :  { %v3104_v20 = vpop.eup %3103 }
 0xb06   :  { %v2041_v54 = vmul.f32 %v3104_v20, %v1925_v48  ;;  %v1519_v48 = vadd.f32 %v3738_v17, %v3775_v34  ;;  %v1594_v17 = vadd.f32 %v3744_v52, %v3793_v60 }
 0xb07   :  { %v3106_v23 = vpop.eup %3105 }
 0xb08   :  { %v2043_v42 = vadd.f32 %v2042_v57, %v2041_v54 }
 0xb0a   :  { %3107 = vtanh.f32 %v2043_v42 }
 0xb17   :  { %v3108_v21 = vpop.eup %3107 }
 0xb18   :  { %v2045_v25 = vmul.f32 %v3108_v21, %v3106_v23 }
 0xb1a   :  { %v2046_v59 = vpack.c.bf16 %v2045_v25, %v2045_v25 }
 0xb1c   :  { %2831 = vmatmul.mubr.msk.bf16.vlgmr.msra.gmra.mxu0 %vm375_vm1, %v2046_v59  ;;  %2832 = vmatmul.mubr.msk.bf16.vlgmr.msra.gmra.mxu1 %vm375_vm1, %v2046_v59 }
 0xb1d   :  { %2181 = vmatpush1.bf16.msra.mxu0 %v3676_v15  ;;  %2222 = vmatpush1.bf16.msra.mxu1 %v3682_v2 }
 0xb1e   :  { %2182 = vmatprep.subr.bf16.mxu0 %v3678_v61  ;;  %2223 = vmatprep.subr.bf16.mxu1 %v3693_v12 }
 0xb1f   :  { %2200 = vmatprep.mubr.bf16.mxu0 %v3261_v0  ;;  %2241 = vmatprep.mubr.bf16.mxu1 %v3261_v0 }
 0xb21   :  { %2183 = vmatpush1.bf16.msra.mxu0 %v3686_v19  ;;  %2224 = vmatpush1.bf16.msra.mxu1 %v3695_v22 }
 0xb22   :  { %2298 = vmatprep.subr.bf16.mxu0 %v3674_v56  ;;  %2339 = vmatprep.subr.bf16.mxu1 %v3680_v5 }
 0xbdc   :  { %v2084_v51 = vpop.f32.mrf.mxu0  ;;  %v2125_v55 = vpop.f32.mrf.mxu1 }
 0xbdd   :  { %v2136_v18 = vadd.f32 %v2084_v51, %v1519_v48  ;;  %v2138_v10 = vadd.f32 %v2125_v55, %v1592_v1 }
 0xbde   :  { %v2086_v32 = vpop.f32.mrf.mxu0  ;;  %v2127_v58 = vpop.f32.mrf.mxu1 }
 0xbdf   :  { %v2833_v46 = vmul.f32 -1.442695, %v2136_v18  ;;  %v2137_v29 = vadd.f32 %v2086_v32, %v1521_v63  ;;  %v2139_v31 = vadd.f32 %v2127_v58, %v1594_v17  ;;  %v1527_v63 = vadd.f32 %v3750_v3, %v3783_v9 }
 0xbe0   :  { %v2088_v26 = vpop.f32.mrf.mxu0  ;;  %v2129_v43 = vpop.f32.mrf.mxu1 }
 0xbe1   :  { %3109 = vpow2.f32 %v2833_v46  ;;  %v2834_v50 = vmul.f32 -1.442695, %v2137_v29  ;;  %v2835_v45 = vmul.f32 -1.442695, %v2139_v31  ;;  %v1598_v31 = vadd.f32 %v3748_v33, %v3798_v44 }
 0xbe2   :  { %v2089_v49 = vpop.f32.mrf.mxu0  ;;  %v2130_v47 = vpop.f32.mrf.mxu1 }
 0xbe3   :  { %3111 = vpow2.f32 %v2834_v50 }
 0xbe4   :  { %3113 = vtanh.f32 %v2138_v10 }
 0xbe5   :  { %3115 = vpow2.f32 %v2835_v45 }
 0xbee   :  { %v3110_v35 = vpop.eup %3109 }
 0xbef   :  { %v2143_v41 = vadd.f32 1.0, %v3110_v35 }
 0xbf0   :  { %v3112_v24 = vpop.eup %3111 }
 0xbf1   :  { %3117 = vrcp.f32 %v2143_v41  ;;  %v2149_v39 = vadd.f32 1.0, %v3112_v24  ;;  %v3114_v40 = vpop.eup %3113 }
 0xbf2   :  { %v3116_v57 = vpop.eup %3115 }
 0xbf3   :  { %3119 = vrcp.f32 %v2149_v39  ;;  %v2156_v52 = vadd.f32 1.0, %v3116_v57 }
 0xbf5   :  { %3121 = vrcp.f32 %v2156_v52 }
 0xbfe   :  { %v3118_v20 = vpop.eup %3117 }
 0xbff   :  { %v2160_v53 = vmul.f32 %v3118_v20, %v3114_v40 }
 0xc00   :  { %v3120_v54 = vpop.eup %3119 }
 0xc01   :  { %v2159_v23 = vmul.f32 %v3120_v54, %v2043_v42  ;;  %v1525_v42 = vadd.f32 %v3746_v27, %v3775_v34  ;;  %v1600_v27 = vadd.f32 %v3752_v36, %v3793_v60 }
 0xc02   :  { %v3122_v6 = vpop.eup %3121 }
 0xc03   :  { %v2161_v21 = vadd.f32 %v2160_v53, %v2159_v23 }
 0xc05   :  { %3123 = vtanh.f32 %v2161_v21 }
 0xc12   :  { %v3124_v25 = vpop.eup %3123 }
 0xc13   :  { %v2163_v59 = vmul.f32 %v3124_v25, %v3122_v6 }
 0xc15   :  { %v2164_v48 = vpack.c.bf16 %v2163_v59, %v2163_v59 }
 0xc17   :  { %2836 = vmatmul.mubr.msk.bf16.vlgmr.msra.gmra.mxu0 %vm375_vm1, %v2164_v48  ;;  %2837 = vmatmul.mubr.msk.bf16.vlgmr.msra.gmra.mxu1 %vm375_vm1, %v2164_v48  ;;  %v1531_v48 = vadd.f32 %v3758_v37, %v3783_v9 }
 0xc18   :  { %2299 = vmatpush1.bf16.msra.mxu0 %v3676_v15  ;;  %2340 = vmatpush1.bf16.msra.mxu1 %v3682_v2 }
 0xc19   :  { %2300 = vmatprep.subr.bf16.mxu0 %v3678_v61  ;;  %2341 = vmatprep.subr.bf16.mxu1 %v3693_v12 }
 0xc1a   :  { %2318 = vmatprep.mubr.bf16.mxu0 %v3261_v0  ;;  %2359 = vmatprep.mubr.bf16.mxu1 %v3261_v0 }
 0xc1c   :  { %2301 = vmatpush1.bf16.msra.mxu0 %v3686_v19  ;;  %2342 = vmatpush1.bf16.msra.mxu1 %v3695_v22 }
 0xc1d   :  { %2416 = vmatprep.subr.bf16.mxu0 %v3674_v56  ;;  %2457 = vmatprep.subr.bf16.mxu1 %v3680_v5 }
 0xcd7   :  { %v2202_v51 = vpop.f32.mrf.mxu0  ;;  %v2243_v55 = vpop.f32.mrf.mxu1 }
 0xcd8   :  { %v2254_v18 = vadd.f32 %v2202_v51, %v1525_v42  ;;  %v2256_v3 = vadd.f32 %v2243_v55, %v1598_v31 }
 0xcd9   :  { %v2204_v32 = vpop.f32.mrf.mxu0  ;;  %v2245_v58 = vpop.f32.mrf.mxu1 }
 0xcda   :  { %v2838_v46 = vmul.f32 -1.442695, %v2254_v18  ;;  %v2255_v29 = vadd.f32 %v2204_v32, %v1527_v63  ;;  %v2257_v17 = vadd.f32 %v2245_v58, %v1600_v27 }
 0xcdb   :  { %v2206_v26 = vpop.f32.mrf.mxu0  ;;  %v2247_v43 = vpop.f32.mrf.mxu1 }
 0xcdc   :  { %3125 = vpow2.f32 %v2838_v46  ;;  %v2839_v50 = vmul.f32 -1.442695, %v2255_v29  ;;  %v2840_v1 = vmul.f32 -1.442695, %v2257_v17  ;;  %v1602_v26 = vadd.f32 %v3756_v16, %v3798_v44 }
 0xcdd   :  { %v2207_v49 = vpop.f32.mrf.mxu0  ;;  %v2248_v47 = vpop.f32.mrf.mxu1 }
 0xcde   :  { %3127 = vpow2.f32 %v2839_v50 }
 0xcdf   :  { %3129 = vtanh.f32 %v2256_v3 }
 0xce0   :  { %3131 = vpow2.f32 %v2840_v1 }
 0xce9   :  { %v3126_v10 = vpop.eup %3125 }
 0xcea   :  { %v2261_v45 = vadd.f32 1.0, %v3126_v10 }
 0xceb   :  { %v3128_v35 = vpop.eup %3127 }
 0xcec   :  { %3133 = vrcp.f32 %v2261_v45  ;;  %v2267_v41 = vadd.f32 1.0, %v3128_v35  ;;  %v3130_v24 = vpop.eup %3129 }
 0xced   :  { %v3132_v39 = vpop.eup %3131 }
 0xcee   :  { %3135 = vrcp.f32 %v2267_v41  ;;  %v2274_v36 = vadd.f32 1.0, %v3132_v39 }
 0xcf0   :  { %3137 = vrcp.f32 %v2274_v36 }
 0xcf9   :  { %v3134_v40 = vpop.eup %3133 }
 0xcfa   :  { %v2278_v57 = vmul.f32 %v3134_v40, %v3130_v24  ;;  %v1535_v40 = vadd.f32 %v3765_v7, %v3775_v34 }
 0xcfb   :  { %v3136_v20 = vpop.eup %3135 }
 0xcfc   :  { %v2277_v53 = vmul.f32 %v3136_v20, %v2161_v21  ;;  %v1529_v21 = vadd.f32 %v3754_v4, %v3775_v34 }
 0xcfd   :  { %v3138_v33 = vpop.eup %3137 }
 0xcfe   :  { %v2279_v54 = vadd.f32 %v2278_v57, %v2277_v53 }
 0xd00   :  { %3139 = vtanh.f32 %v2279_v54 }
 0xd0d   :  { %v3140_v52 = vpop.eup %3139 }
 0xd0e   :  { %v2281_v23 = vmul.f32 %v3140_v52, %v3138_v33 }
 0xd10   :  { %v2282_v6 = vpack.c.bf16 %v2281_v23, %v2281_v23  ;;  %v1608_v23 = vadd.f32 %v3767_v8, %v3798_v44 }
 0xd12   :  { %2841 = vmatmul.mubr.msk.bf16.vlgmr.msra.gmra.mxu0 %vm375_vm1, %v2282_v6  ;;  %2842 = vmatmul.mubr.msk.bf16.vlgmr.msra.gmra.mxu1 %vm375_vm1, %v2282_v6 }
 0xd13   :  { %2417 = vmatpush1.bf16.msra.mxu0 %v3676_v15  ;;  %2458 = vmatpush1.bf16.msra.mxu1 %v3682_v2 }
 0xd14   :  { %2418 = vmatprep.subr.bf16.mxu0 %v3678_v61  ;;  %2459 = vmatprep.subr.bf16.mxu1 %v3693_v12 }
 0xd15   :  { %2436 = vmatprep.mubr.bf16.mxu0 %v3261_v0  ;;  %2477 = vmatprep.mubr.bf16.mxu1 %v3261_v0 }
 0xd17   :  { %2419 = vmatpush1.bf16.msra.mxu0 %v3686_v19  ;;  %2460 = vmatpush1.bf16.msra.mxu1 %v3695_v22 }
 0xd18   :  { %2534 = vmatprep.subr.bf16.mxu0 %v3674_v56  ;;  %2575 = vmatprep.subr.bf16.mxu1 %v3680_v5  ;;  %v1604_v5 = vadd.f32 %v3760_v28, %v3793_v60 }
 0xdd2   :  { %v2320_v25 = vpop.f32.mrf.mxu0  ;;  %v2361_v59 = vpop.f32.mrf.mxu1 }
 0xdd3   :  { %v2372_v42 = vadd.f32 %v2320_v25, %v1529_v21  ;;  %v2374_v37 = vadd.f32 %v2361_v59, %v1602_v26  ;;  %v2932_v26 = vld [vmem:[#allocation8] sm:$0xff]  }
 0xdd4   :  { %v2322_v51 = vpop.f32.mrf.mxu0  ;;  %v2363_v55 = vpop.f32.mrf.mxu1 }
 0xdd5   :  { %v2843_v63 = vmul.f32 -1.442695, %v2372_v42  ;;  %v2373_v18 = vadd.f32 %v2322_v51, %v1531_v48  ;;  %v2375_v4 = vadd.f32 %v2363_v55, %v1604_v5  ;;  %v2931_v5 = vld [vmem:[#allocation8 + $0x8] sm:$0xff]  }
 0xdd6   :  { %v2324_v32 = vpop.f32.mrf.mxu0  ;;  %v2365_v58 = vpop.f32.mrf.mxu1 }
 0xdd7   :  { %3141 = vpow2.f32 %v2843_v63  ;;  %v2844_v46 = vmul.f32 -1.442695, %v2373_v18  ;;  %v2845_v43 = vmul.f32 -1.442695, %v2375_v4  ;;  %v3262_v4 = vmov 0.0  }
 0xdd8   :  { %v2325_v56 = vpop.f32.mrf.mxu0  ;;  %v2366_v29 = vpop.f32.mrf.mxu1 }
 0xdd9   :  { %3143 = vpow2.f32 %v2844_v46 }
 0xdda   :  { %3145 = vtanh.f32 %v2374_v37  ;;  %v1539_v37 = vadd.f32 %v3777_v62, %v3775_v34  ;;  %v1614_v34 = vadd.f32 %v3787_v38, %v3793_v60 }
 0xddb   :  { %3147 = vpow2.f32 %v2845_v43 }
 0xde4   :  { %v3142_v50 = vpop.eup %3141 }
 0xde5   :  { %v2379_v49 = vadd.f32 1.0, %v3142_v50 }
 0xde6   :  { %v3144_v47 = vpop.eup %3143 }
 0xde7   :  { %3149 = vrcp.f32 %v2379_v49  ;;  %v2385_v27 = vadd.f32 1.0, %v3144_v47  ;;  %v3146_v17 = vpop.eup %3145  ;;  %v1541_v49 = vadd.f32 %v3785_v14, %v3783_v9 }
 0xde8   :  { %v3148_v31 = vpop.eup %3147 }
 0xde9   :  { %3151 = vrcp.f32 %v2385_v27  ;;  %v2392_v28 = vadd.f32 1.0, %v3148_v31 }
 0xdeb   :  { %3153 = vrcp.f32 %v2392_v28 }
 0xdf4   :  { %v3150_v3 = vpop.eup %3149 }
 0xdf5   :  { %v2396_v1 = vmul.f32 %v3150_v3, %v3146_v17 }
 0xdf6   :  { %v3152_v10 = vpop.eup %3151 }
 0xdf7   :  { %v2395_v45 = vmul.f32 %v3152_v10, %v2279_v54 }
 0xdf8   :  { %v3154_v16 = vpop.eup %3153 }
 0xdf9   :  { %v2397_v35 = vadd.f32 %v2396_v1, %v2395_v45 }
 0xdfb   :  { %3155 = vtanh.f32 %v2397_v35 }
 0xe08   :  { %v3156_v41 = vpop.eup %3155 }
 0xe09   :  { %v2399_v24 = vmul.f32 %v3156_v41, %v3154_v16  ;;  %v1612_v16 = vadd.f32 %v3779_v30, %v3798_v44 }
 0xe0b   :  { %v2400_v39 = vpack.c.bf16 %v2399_v24, %v2399_v24 }
 0xe0d   :  { %2846 = vmatmul.mubr.msk.bf16.vlgmr.msra.gmra.mxu0 %vm375_vm1, %v2400_v39  ;;  %2847 = vmatmul.mubr.msk.bf16.vlgmr.msra.gmra.mxu1 %vm375_vm1, %v2400_v39 }
 0xe0e   :  { %2535 = vmatpush1.bf16.msra.mxu0 %v3676_v15  ;;  %2576 = vmatpush1.bf16.msra.mxu1 %v3682_v2  ;;  %v1537_v15 = vadd.f32 %v3769_v11, %v3783_v9 }
 0xe0f   :  { %2536 = vmatprep.subr.bf16.mxu0 %v3678_v61  ;;  %2577 = vmatprep.subr.bf16.mxu1 %v3693_v12 }
 0xe10   :  { %2554 = vmatprep.mubr.bf16.mxu0 %v3261_v0  ;;  %2595 = vmatprep.mubr.bf16.mxu1 %v3261_v0 }
 0xe12   :  { %2537 = vmatpush1.bf16.msra.mxu0 %v3686_v19  ;;  %2578 = vmatpush1.bf16.msra.mxu1 %v3695_v22  ;;  %v1610_v22 = vadd.f32 %v3771_v13, %v3793_v60 }
 0xe13   :  { %2863 = vmatprep.subr.bf16.mxu0 %v3262_v4 }
 0xecd   :  { %v2438_v57 = vpop.f32.mrf.mxu0  ;;  %v2479_v20 = vpop.f32.mrf.mxu1 }
 0xece   :  { %v2490_v2 = vadd.f32 %v2438_v57, %v1535_v40  ;;  %v2492_v11 = vadd.f32 %v2479_v20, %v1608_v23 }
 0xecf   :  { %v2440_v61 = vpop.f32.mrf.mxu0  ;;  %v2481_v36 = vpop.f32.mrf.mxu1 }
 0xed0   :  { %v2848_v12 = vmul.f32 -1.442695, %v2490_v2  ;;  %v2491_v53 = vadd.f32 %v2440_v61, %v1537_v15  ;;  %v2493_v7 = vadd.f32 %v2481_v36, %v1610_v22 }
 0xed1   :  { %v2442_v54 = vpop.f32.mrf.mxu0  ;;  %v2483_v33 = vpop.f32.mrf.mxu1 }
 0xed2   :  { %3157 = vpow2.f32 %v2848_v12  ;;  %v2849_v0 = vmul.f32 -1.442695, %v2491_v53  ;;  %v2850_v6 = vmul.f32 -1.442695, %v2493_v7  ;;  %v2856_v54 = vld [vmem:[%s3944_s8] ss:$0 sm:$0xff] }
 0xed3   :  { %v2443_v19 = vpop.f32.mrf.mxu0  ;;  %v2484_v52 = vpop.f32.mrf.mxu1 }
 0xed4   :  { %3159 = vpow2.f32 %v2849_v0 }
 0xed5   :  { %3161 = vtanh.f32 %v2492_v11 }
 0xed6   :  { %3163 = vpow2.f32 %v2850_v6 }
 0xedf   :  { %v3158_v21 = vpop.eup %3157 }
 0xee0   :  { %v2497_v25 = vadd.f32 1.0, %v3158_v21 }
 0xee1   :  { %v3160_v59 = vpop.eup %3159 }
 0xee2   :  { %3165 = vrcp.f32 %v2497_v25  ;;  %v2503_v48 = vadd.f32 1.0, %v3160_v59  ;;  %v3162_v42 = vpop.eup %3161 }
 0xee3   :  { %v3164_v51 = vpop.eup %3163 }
 0xee4   :  { %3167 = vrcp.f32 %v2503_v48  ;;  %v2510_v13 = vadd.f32 1.0, %v3164_v51 }
 0xee6   :  { %3169 = vrcp.f32 %v2510_v13 }
 0xeef   :  { %v3166_v55 = vpop.eup %3165 }
 0xef0   :  { %v2514_v63 = vmul.f32 %v3166_v55, %v3162_v42 }
 0xef1   :  { %v3168_v18 = vpop.eup %3167 }
 0xef2   :  { %v2513_v32 = vmul.f32 %v3168_v18, %v2397_v35 }
 0xef3   :  { %v3170_v8 = vpop.eup %3169 }
 0xef4   :  { %v2515_v58 = vadd.f32 %v2514_v63, %v2513_v32 }
 0xef6   :  { %3171 = vtanh.f32 %v2515_v58 }
 0xf03   :  { %v3172_v46 = vpop.eup %3171 }
 0xf04   :  { %v2517_v56 = vmul.f32 %v3172_v46, %v3170_v8 }
 0xf06   :  { %v2518_v29 = vpack.c.bf16 %v2517_v56, %v2517_v56 }
 0xf08   :  { %2851 = vmatmul.mubr.msk.bf16.vlgmr.msra.gmra.mxu0 %vm375_vm1, %v2518_v29  ;;  %2852 = vmatmul.mubr.msk.bf16.vlgmr.msra.gmra.mxu1 %vm375_vm1, %v2518_v29 }
 0xf09   :  { %2867 = vmatprep.mubr.msk.bf16.mxu0 %vm3263_vm3, %v3262_v4  ;;  %2864 = vmatpush3.bf16.msra.mxu0 %v2931_v5 }
 0xf0a   :  { %2865 = vmatprep.subr.bf16.mxu0 %v3262_v4 }
 0xf0d   :  { %2866 = vmatpush3.bf16.msra.mxu0 %v2932_v26 }
 0xfc8   :  { %v2556_v43 = vpop.f32.mrf.mxu0  ;;  %v2597_v50 = vpop.f32.mrf.mxu1 }
 0xfc9   :  { %v2608_v47 = vadd.f32 %v2556_v43, %v1539_v37  ;;  %v2610_v9 = vadd.f32 %v2597_v50, %v1612_v16 }
 0xfca   :  { %v2558_v27 = vpop.f32.mrf.mxu0  ;;  %v2599_v17 = vpop.f32.mrf.mxu1 }
 0xfcb   :  { %v2853_v31 = vmul.f32 -1.442695, %v2608_v47  ;;  %v2609_v3 = vadd.f32 %v2558_v27, %v1541_v49  ;;  %v2611_v62 = vadd.f32 %v2599_v17, %v1614_v34 }
 0xfcc   :  { %v2560_v1 = vpop.f32.mrf.mxu0  ;;  %v2601_v10 = vpop.f32.mrf.mxu1 }
 0xfcd   :  { %3173 = vpow2.f32 %v2853_v31  ;;  %v2854_v28 = vmul.f32 -1.442695, %v2609_v3  ;;  %v2855_v14 = vmul.f32 -1.442695, %v2611_v62 }
 0xfce   :  { %v2561_v45 = vpop.f32.mrf.mxu0  ;;  %v2602_v35 = vpop.f32.mrf.mxu1 }
 0xfcf   :  { %3175 = vpow2.f32 %v2854_v28 }
 0xfd0   :  { %3177 = vtanh.f32 %v2610_v9 }
 0xfd1   :  { %3179 = vpow2.f32 %v2855_v14 }
 0xfda   :  { %v3174_v41 = vpop.eup %3173 }
 0xfdb   :  { %v2615_v24 = vadd.f32 1.0, %v3174_v41 }
 0xfdc   :  { %v3176_v39 = vpop.eup %3175 }
 0xfdd   :  { %3181 = vrcp.f32 %v2615_v24  ;;  %v2621_v40 = vadd.f32 1.0, %v3176_v39  ;;  %v3178_v57 = vpop.eup %3177 }
 0xfde   :  { %v3180_v20 = vpop.eup %3179 }
 0xfdf   :  { %3183 = vrcp.f32 %v2621_v40  ;;  %v2628_v38 = vadd.f32 1.0, %v3180_v20 }
 0xfe1   :  { %3185 = vrcp.f32 %v2628_v38 }
 0xfea   :  { %v3182_v15 = vpop.eup %3181 }
 0xfeb   :  { %v2632_v2 = vmul.f32 %v3182_v15, %v3178_v57 }
 0xfec   :  { %v3184_v61 = vpop.eup %3183 }
 0xfed   :  { %v2631_v60 = vmul.f32 %v3184_v61, %v2515_v58 }
 0xfee   :  { %v3186_v30 = vpop.eup %3185 }
 0xfef   :  { %v2633_v36 = vadd.f32 %v2632_v2, %v2631_v60 }
 0xff1   :  { %3187 = vtanh.f32 %v2633_v36 }
 0xffe   :  { %v3188_v44 = vpop.eup %3187 }
 0xfff   :  { %v2635_v12 = vmul.f32 %v3188_v44, %v3186_v30 }
0x1001   :  { %v2636_v53 = vpack.c.bf16 %v2635_v12, %v2635_v12 }
0x1003   :  { %2868 = vmatmul.mubr.msk.bf16.vlgmr.msra.gmra.mxu0 %vm375_vm1, %v2636_v53 }
0x10c3   :  { %v2697_v33 = vpop.f32.mrf.mxu0 }
0x10c4   :  { %v2698_v0 = vadd.f32 %v2856_v54, %v2697_v33 }
0x10c5   :  { %v2869_v19 = vpop.f32.mrf.mxu0 }
0x10c6   :  { %v2703_v52 = vmax.f32 %v2698_v0, 0.0 }
0x10c7   :  { %v2700_v22 = vpop.f32.mrf.mxu0 }
0x10c8   :  { %2704 = vst [vmem:[#allocation10] sm:$0xff] %v2703_v52 }
0x10c9   :  { %v2870_v7 = vpop.f32.mrf.mxu0 }
0x10ca   :  { %3240 = shalt.err (!%p3237_p0)
}
0x10cb   :  { %2714 = dma.vmem_to_hbm [thread:$0]  %s2712_s24, 128, %s3945_s9, [#allocation7]  }
0x10cc   :  { %3253 = dma.done.wait [#allocation7], 128  }
0x10cd   :  { %3254 = vsyncadd [#allocation7], 4294967168 }
0x10ce   :  { %2718 = vsyncpa [#allocation6], 1 }
0x10cf   :  { %2719 = vsyncpa [#allocation9], 1 }
0x10d0   :  { %2720 = vsyncpa [#allocation7], 1 }

</bundles_post_ra>
